<compile_context>
chip_gen: v7x
topology: tpu7x:2x2x1
jax: 0.10.0
libtpu: 0.0.40
codegen_flags: <defaults>
</compile_context>

<pallas_src>
import math

import jax
import jax.numpy as jnp
from jax.experimental import pallas as pl
from jax.experimental.pallas import tpu as pltpu

# ---------------- SDE configuration (VE-SDE style std_fn) -------------------
T_RANGE = (0.0, 1.0)            # self.sde.t_range
SIGMA_MIN = 0.01
SIGMA_MAX = 50.0
LOG_RATIO = math.log(SIGMA_MAX / SIGMA_MIN)
INV_SIGMA_MIN = 1.0 / SIGMA_MIN
# std_fn(t) = sigma_min * (sigma_max / sigma_min) ** t
# 1/std_fn(t) = (1/sigma_min) * exp(-t * log(sigma_max/sigma_min))


# ---------------------------- Pallas kernel ---------------------------------
def score_kernel(x_ref, emb_ref, t_ref, w1_ref, wt_ref, b1_ref,
                 w2_ref, b2_ref, o_ref):
    # First layer: h = relu(x @ W1 + emb @ Wt + b1)
    # bf16 operands on the MXU, f32 accumulation; bias/ReLU in f32.
    h = jnp.dot(x_ref[...].astype(jnp.bfloat16), w1_ref[...],
                preferred_element_type=jnp.float32)
    h = h + jnp.dot(emb_ref[...].astype(jnp.bfloat16), wt_ref[...],
                    preferred_element_type=jnp.float32)
    h = jnp.maximum(h + b1_ref[...], 0.0)

    # Second layer for this output tile only (W2/b2 streamed per grid step;
    # a single step when the grid is collapsed on single-TC chips).
    y = jnp.dot(h.astype(w2_ref.dtype), w2_ref[...],
                preferred_element_type=jnp.float32)
    y = y + b2_ref[...]

    # mask + _batch_mult(1 / marginal_prob_std(t), score):
    # recomputed per tile — B exps on the EUP slot, effectively free.
    t = t_ref[...]                                         # (B, 1) f32
    in_range = jnp.logical_and(t >= T_RANGE[0], t <= T_RANGE[1])
    inv_std = INV_SIGMA_MIN * jnp.exp(-t * LOG_RATIO)      # 1 / std_fn(t)
    scale = jnp.where(in_range, inv_std, 0.0)              # out-of-range -> 0
    o_ref[...] = (y * scale).astype(o_ref.dtype)


# ------------------------------ Helpers --------------------------------------
def _num_tensorcores():
    """Best-effort TensorCore count per chip (v5e/v6e: 1, v7x: 2)."""
    try:
        info = pltpu.get_tpu_info()
        for attr in ("num_cores", "core_count", "num_tensorcores"):
            n = getattr(info, attr, None)
            if n:
                return int(n)
    except Exception:
        pass
    try:
        kind = jax.devices()[0].device_kind.lower()
        if "v7" in kind:
            return 2
    except Exception:
        pass
    return 1


def make_params(key, D, emb_dim, hidden):
    k = jax.random.split(key, 4)
    return {
        "freqs": jax.random.normal(k[0], (emb_dim // 2,), jnp.float32) * 16.0,
        # bf16 weights: halve HBM weight traffic, native MXU rate.
        "w1": (jax.random.normal(k[1], (D, hidden), jnp.float32)
               / jnp.sqrt(D)).astype(jnp.bfloat16),
        "wt": (jax.random.normal(k[2], (emb_dim, hidden), jnp.float32)
               / jnp.sqrt(emb_dim)).astype(jnp.bfloat16),
        "b1": jnp.zeros((1, hidden), jnp.float32),
        "w2": (jax.random.normal(k[3], (hidden, D), jnp.float32)
               / jnp.sqrt(hidden)).astype(jnp.bfloat16),
        "b2": jnp.zeros((1, D), jnp.float32),
    }


# ------------------------------ Wrapper --------------------------------------
def score_forward(x, t, params):
    """x: (B, C, H, W) float32 NCHW; t: scalar or (B,) float32."""
    B, C, H, W = x.shape
    D = C * H * W
    if t.ndim == 0:                          # t * torch.ones(x.shape[0])
        t = t * jnp.ones((B,), jnp.float32)

    x_flat = x.reshape(B, D)                 # layout-preserving, no copy

    # Gaussian-Fourier time features (tiny: B x emb_dim, stays in wrapper).
    freqs = params["freqs"]
    emb_dim = 2 * freqs.shape[0]
    proj = t[:, None] * freqs[None, :] * (2.0 * jnp.pi)
    emb = jnp.concatenate([jnp.sin(proj), jnp.cos(proj)], axis=-1)
    t2 = t.reshape(B, 1).astype(jnp.float32)

    w1, wt = params["w1"], params["wt"]
    b1, w2, b2 = params["b1"], params["w2"], params["b2"]
    hidden = w1.shape[1]

    # Grid over output features D:
    #   * single-TC chips (v5e/v6e): one step (no first-GEMM recompute, no
    #     per-step pipeline overhead; total VMEM ~1.2 MiB fits everywhere),
    #   * multi-TC chips (v7x): num_cores-way "parallel" split so each core
    #     streams its half of W2/b2/out (the dominant HBM bytes).
    n_cores = _num_tensorcores()
    n_tiles = n_cores if (n_cores > 1 and D % (n_cores * 128) == 0) else 1
    TN = D // n_tiles

    flops = 2 * B * (D + emb_dim) * hidden + 2 * B * hidden * D
    bytes_accessed = (x_flat.size * 4 + emb.size * 4 + t2.size * 4
                      + w1.size * 2 + wt.size * 2 + b1.size * 4
                      + w2.size * 2 + b2.size * 4 + B * D * 4)

    out_flat = pl.pallas_call(
        score_kernel,
        out_shape=jax.ShapeDtypeStruct((B, D), jnp.float32),
        grid_spec=pltpu.PrefetchScalarGridSpec(
            num_scalar_prefetch=0,
            grid=(n_tiles,),
            in_specs=[
                pl.BlockSpec((B, D), lambda j: (0, 0)),             # x (f32, resident)
                pl.BlockSpec((B, emb_dim), lambda j: (0, 0)),       # emb (resident)
                pl.BlockSpec((B, 1), lambda j: (0, 0)),             # t
                pl.BlockSpec((D, hidden), lambda j: (0, 0)),        # W1 (resident)
                pl.BlockSpec((emb_dim, hidden), lambda j: (0, 0)),  # Wt (resident)
                pl.BlockSpec((1, hidden), lambda j: (0, 0)),        # b1
                pl.BlockSpec((hidden, TN), lambda j: (0, j)),       # W2 tile (streamed)
                pl.BlockSpec((1, TN), lambda j: (0, j)),            # b2 tile
            ],
            out_specs=pl.BlockSpec((B, TN), lambda j: (0, j)),
        ),
        compiler_params=pltpu.CompilerParams(
            dimension_semantics=(("parallel",) if n_tiles > 1
                                 else ("arbitrary",))),
        cost_estimate=pl.CostEstimate(
            flops=flops,
            transcendentals=B * n_tiles,
            bytes_accessed=bytes_accessed),
    )(x_flat, emb, t2, w1, wt, b1, w2, b2)

    # TODO(synk): `self.correction` (None here), the return_trace branch and
    # the "x is large" host-side print have no kernel equivalent and are omitted.
    return out_flat.reshape(B, C, H, W)


# ------------------------- Pure-JAX reference --------------------------------
def score_reference(x, t, params):
    B, C, H, W = x.shape
    D = C * H * W
    if t.ndim == 0:
        t = t * jnp.ones((B,), jnp.float32)
    xf = x.reshape(B, D)
    proj = t[:, None] * params["freqs"][None, :] * (2.0 * jnp.pi)
    emb = jnp.concatenate([jnp.sin(proj), jnp.cos(proj)], axis=-1)
    h = (jnp.dot(xf.astype(jnp.bfloat16), params["w1"],
                 preferred_element_type=jnp.float32)
         + jnp.dot(emb.astype(jnp.bfloat16), params["wt"],
                   preferred_element_type=jnp.float32))
    h = jnp.maximum(h + params["b1"], 0.0)
    y = jnp.dot(h.astype(jnp.bfloat16), params["w2"],
                preferred_element_type=jnp.float32) + params["b2"]
    mask = (t >= T_RANGE[0]) & (t <= T_RANGE[1])
    scale = jnp.where(mask, INV_SIGMA_MIN * jnp.exp(-t * LOG_RATIO), 0.0)
    return (y * scale[:, None]).reshape(B, C, H, W)


# --------------------------------- Main ---------------------------------------
if __name__ == "__main__":
    B, C, H, W = 8, 4, 16, 16
    D = C * H * W                 # 1024
    EMB_DIM = 128
    HIDDEN = 256

    key = jax.random.PRNGKey(0)
    kx, kt, kp = jax.random.split(key, 3)
    x = jax.random.normal(kx, (B, C, H, W), jnp.float32)
    t = jax.random.uniform(kt, (B,), jnp.float32, minval=0.05, maxval=0.95)
    params = make_params(kp, D, EMB_DIM, HIDDEN)

    out = jax.block_until_ready(jax.jit(score_forward)(x, t, params))
    ref = score_reference(x, t, params)

    assert out.shape == (B, C, H, W)
    assert jnp.allclose(out, ref, rtol=1e-3, atol=1e-3), "mismatch vs reference"

    print("KERNEL_OK")
</pallas_src>

<mosaic_0001>
module attributes {stable_mosaic.version = 11 : i64} {
  func.func @score_kernel(%arg0: i32, %arg1: memref<8x1024xf32, #tpu.memory_space<vmem>>, %arg2: memref<8x128xf32, #tpu.memory_space<vmem>>, %arg3: memref<8x1xf32, #tpu.memory_space<vmem>>, %arg4: memref<1024x256xbf16, #tpu.memory_space<vmem>>, %arg5: memref<128x256xbf16, #tpu.memory_space<vmem>>, %arg6: memref<1x256xf32, #tpu.memory_space<vmem>>, %arg7: memref<256x1024xbf16, #tpu.memory_space<vmem>>, %arg8: memref<1x1024xf32, #tpu.memory_space<vmem>>, %arg9: memref<8x1024xf32, #tpu.memory_space<vmem>>) attributes {dimension_semantics = [#tpu.dimension_semantics<arbitrary>], iteration_bounds = array<i64: 1>, scalar_prefetch = 0 : i64, scratch_operands = 0 : i64, tpu.core_type = #tpu.core_type<tc>, window_params = [{pipeline_mode = #tpu.pipeline_mode<synchronous>, transform_indices = @transform_0, window_bounds = array<i64: 8, 1024>}, {pipeline_mode = #tpu.pipeline_mode<synchronous>, transform_indices = @transform_1, window_bounds = array<i64: 8, 128>}, {pipeline_mode = #tpu.pipeline_mode<synchronous>, transform_indices = @transform_2, window_bounds = array<i64: 8, 1>}, {pipeline_mode = #tpu.pipeline_mode<synchronous>, transform_indices = @transform_3, window_bounds = array<i64: 1024, 256>}, {pipeline_mode = #tpu.pipeline_mode<synchronous>, transform_indices = @transform_4, window_bounds = array<i64: 128, 256>}, {pipeline_mode = #tpu.pipeline_mode<synchronous>, transform_indices = @transform_5, window_bounds = array<i64: 1, 256>}, {transform_indices = @transform_6, window_bounds = array<i64: 256, 1024>}, {transform_indices = @transform_7, window_bounds = array<i64: 1, 1024>}, {transform_indices = @transform_8, window_bounds = array<i64: 8, 1024>}]} {
    %c0 = arith.constant 0 : index
    %c0_0 = arith.constant 0 : index
    %0 = vector.load %arg1[%c0, %c0_0] : memref<8x1024xf32, #tpu.memory_space<vmem>>, vector<8x1024xf32>
    %1 = arith.truncf %0 : vector<8x1024xf32> to vector<8x1024xbf16>
    %c0_1 = arith.constant 0 : index
    %c0_2 = arith.constant 0 : index
    %2 = vector.load %arg4[%c0_1, %c0_2] : memref<1024x256xbf16, #tpu.memory_space<vmem>>, vector<1024x256xbf16>
    %cst = arith.constant dense<0.000000e+00> : vector<8x256xf32>
    %3 = tpu.matmul %1, %2, %cst {dimension_numbers = #tpu.dot_dimension_numbers<[1], [0], [0], [1], [0, 0, 1, 1], [], []>} : vector<8x1024xbf16>, vector<1024x256xbf16>, vector<8x256xf32> -> vector<8x256xf32>
    %c0_3 = arith.constant 0 : index
    %c0_4 = arith.constant 0 : index
    %4 = vector.load %arg2[%c0_3, %c0_4] : memref<8x128xf32, #tpu.memory_space<vmem>>, vector<8x128xf32>
    %5 = arith.truncf %4 : vector<8x128xf32> to vector<8x128xbf16>
    %c0_5 = arith.constant 0 : index
    %c0_6 = arith.constant 0 : index
    %6 = vector.load %arg5[%c0_5, %c0_6] : memref<128x256xbf16, #tpu.memory_space<vmem>>, vector<128x256xbf16>
    %cst_7 = arith.constant dense<0.000000e+00> : vector<8x256xf32>
    %7 = tpu.matmul %5, %6, %cst_7 {dimension_numbers = #tpu.dot_dimension_numbers<[1], [0], [0], [1], [0, 0, 1, 1], [], []>} : vector<8x128xbf16>, vector<128x256xbf16>, vector<8x256xf32> -> vector<8x256xf32>
    %8 = arith.addf %3, %7 : vector<8x256xf32>
    %c0_8 = arith.constant 0 : index
    %c0_9 = arith.constant 0 : index
    %9 = vector.load %arg6[%c0_8, %c0_9] : memref<1x256xf32, #tpu.memory_space<vmem>>, vector<1x256xf32>
    %10 = vector.broadcast %9 : vector<1x256xf32> to vector<8x256xf32>
    %11 = arith.addf %8, %10 : vector<8x256xf32>
    %cst_10 = arith.constant 0.000000e+00 : f32
    %12 = vector.broadcast %cst_10 : f32 to vector<8x256xf32>
    %13 = arith.maximumf %11, %12 : vector<8x256xf32>
    %14 = arith.truncf %13 : vector<8x256xf32> to vector<8x256xbf16>
    %c0_11 = arith.constant 0 : index
    %c0_12 = arith.constant 0 : index
    %15 = vector.load %arg7[%c0_11, %c0_12] : memref<256x1024xbf16, #tpu.memory_space<vmem>>, vector<256x1024xbf16>
    %cst_13 = arith.constant dense<0.000000e+00> : vector<8x1024xf32>
    %16 = tpu.matmul %14, %15, %cst_13 {dimension_numbers = #tpu.dot_dimension_numbers<[1], [0], [0], [1], [0, 0, 1, 1], [], []>} : vector<8x256xbf16>, vector<256x1024xbf16>, vector<8x1024xf32> -> vector<8x1024xf32>
    %c0_14 = arith.constant 0 : index
    %c0_15 = arith.constant 0 : index
    %17 = vector.load %arg8[%c0_14, %c0_15] : memref<1x1024xf32, #tpu.memory_space<vmem>>, vector<1x1024xf32>
    %18 = vector.broadcast %17 : vector<1x1024xf32> to vector<8x1024xf32>
    %19 = arith.addf %16, %18 : vector<8x1024xf32>
    %c0_16 = arith.constant 0 : index
    %c0_17 = arith.constant 0 : index
    %20 = vector.load %arg3[%c0_16, %c0_17] : memref<8x1xf32, #tpu.memory_space<vmem>>, vector<8x1xf32>
    %cst_18 = arith.constant 0.000000e+00 : f32
    %21 = vector.broadcast %cst_18 : f32 to vector<8x1xf32>
    %22 = arith.cmpf oge, %20, %21 : vector<8x1xf32>
    %cst_19 = arith.constant 1.000000e+00 : f32
    %23 = vector.broadcast %cst_19 : f32 to vector<8x1xf32>
    %24 = arith.cmpf ole, %20, %23 : vector<8x1xf32>
    %25 = arith.andi %22, %24 : vector<8x1xi1>
    %cst_20 = arith.constant 0.000000e+00 : f32
    %26 = vector.broadcast %cst_20 : f32 to vector<8x1xf32>
    %27 = arith.subf %26, %20 : vector<8x1xf32>
    %cst_21 = arith.constant 8.51719284 : f32
    %28 = vector.broadcast %cst_21 : f32 to vector<8x1xf32>
    %29 = arith.mulf %27, %28 : vector<8x1xf32>
    %30 = math.exp %29 : vector<8x1xf32>
    %cst_22 = arith.constant 1.000000e+02 : f32
    %31 = vector.broadcast %cst_22 : f32 to vector<8x1xf32>
    %32 = arith.mulf %31, %30 : vector<8x1xf32>
    %cst_23 = arith.constant 0.000000e+00 : f32
    %33 = vector.broadcast %cst_23 : f32 to vector<8x1xf32>
    %34 = arith.select %25, %32, %33 : vector<8x1xi1>, vector<8x1xf32>
    %35 = vector.broadcast %34 : vector<8x1xf32> to vector<8x1024xf32>
    %36 = arith.mulf %19, %35 : vector<8x1024xf32>
    %c0_24 = arith.constant 0 : index
    %c0_25 = arith.constant 0 : index
    %37 = vector.load %arg9[%c0_24, %c0_25] : memref<8x1024xf32, #tpu.memory_space<vmem>>, vector<8x1024xf32>
    tpu.vector_store %arg9[%c0_24, %c0_25], %36 {strides = array<i32>} : memref<8x1024xf32, #tpu.memory_space<vmem>>, vector<8x1024xf32>,
    return
  }
  func.func @transform_0(%arg0: i32) -> (i32, i32) {
    %c0_i32 = arith.constant 0 : i32
    %c0_i32_0 = arith.constant 0 : i32
    %c0_i32_1 = arith.constant 0 : i32
    return %c0_i32, %c0_i32_0 : i32, i32
  }
  func.func @transform_1(%arg0: i32) -> (i32, i32) {
    %c0_i32 = arith.constant 0 : i32
    %c0_i32_0 = arith.constant 0 : i32
    %c0_i32_1 = arith.constant 0 : i32
    return %c0_i32, %c0_i32_0 : i32, i32
  }
  func.func @transform_2(%arg0: i32) -> (i32, i32) {
    %c0_i32 = arith.constant 0 : i32
    %c0_i32_0 = arith.constant 0 : i32
    %c0_i32_1 = arith.constant 0 : i32
    return %c0_i32, %c0_i32_0 : i32, i32
  }
  func.func @transform_3(%arg0: i32) -> (i32, i32) {
    %c0_i32 = arith.constant 0 : i32
    %c0_i32_0 = arith.constant 0 : i32
    %c0_i32_1 = arith.constant 0 : i32
    return %c0_i32, %c0_i32_0 : i32, i32
  }
  func.func @transform_4(%arg0: i32) -> (i32, i32) {
    %c0_i32 = arith.constant 0 : i32
    %c0_i32_0 = arith.constant 0 : i32
    %c0_i32_1 = arith.constant 0 : i32
    return %c0_i32, %c0_i32_0 : i32, i32
  }
  func.func @transform_5(%arg0: i32) -> (i32, i32) {
    %c0_i32 = arith.constant 0 : i32
    %c0_i32_0 = arith.constant 0 : i32
    %c0_i32_1 = arith.constant 0 : i32
    return %c0_i32, %c0_i32_0 : i32, i32
  }
  func.func @transform_6(%arg0: i32) -> (i32, i32) {
    %c0_i32 = arith.constant 0 : i32
    %c0_i32_0 = arith.constant 0 : i32
    return %c0_i32, %arg0 : i32, i32
  }
  func.func @transform_7(%arg0: i32) -> (i32, i32) {
    %c0_i32 = arith.constant 0 : i32
    %c0_i32_0 = arith.constant 0 : i32
    return %c0_i32, %arg0 : i32, i32
  }
  func.func @transform_8(%arg0: i32) -> (i32, i32) {
    %c0_i32 = arith.constant 0 : i32
    %c0_i32_0 = arith.constant 0 : i32
    return %c0_i32, %arg0 : i32, i32
  }
}

</mosaic_0001>

<bundles_post_ra>
// kernel: score_forward.1
= control target key start
LH: loop header
LB: loop body
LE: loop exit
PB: predicated region body
PF: predicated region fallthrough
CT: control target
= control target key end

     0   :  { %13 = vsyncpa [#allocation3], 0  ;;  %s2950_s0 = inlined_call_operand.vmem [shape: f32[8,1024], index: 0, kind: input, shape index: {}]   ;;  %s2951_s1 = inlined_call_operand.vmem [shape: f32[8,128], index: 1, kind: input, shape index: {}]   ;;  %s2952_s2 = inlined_call_operand.vmem [shape: f32[8,1], index: 2, kind: input, shape index: {}]   ;;  %s2953_s3 = inlined_call_operand.hbm [shape: bf16[1024,256], index: 3, kind: input, shape index: {}]   ;;  %s2954_s4 = inlined_call_operand.vmem [shape: bf16[128,256], index: 4, kind: input, shape index: {}]   ;;  %s2955_s5 = inlined_call_operand.vmem [shape: f32[1,256], index: 5, kind: input, shape index: {}]   ;;  %s2956_s6 = inlined_call_operand.hbm [shape: bf16[256,1024], index: 6, kind: input, shape index: {}]   ;;  %s2957_s7 = inlined_call_operand.vmem [shape: f32[1,1024], index: 7, kind: input, shape index: {}]   ;;  %s2958_s8 = inlined_call_operand.vmem [shape: f32[8,1024], index: 8, kind: output, shape index: {}]  }
   0x1   :  { %14 = vsyncpa [#allocation5], 0  ;;  %s2720_s27 = smov [#allocation2]   ;;  %s2672_s9 = scalar_lea.hbm %s2953_s3, 16384 }
   0x2   :  { %s26_s28 = sshll.u32 %s2720_s27, 4  ;;  %p2673_p0 = scmp.ne.s32.totalorder %s2953_s3, %s2672_s9  ;;  %s27_s28 = int_to_ptr.vmem [resolvable:$true] %s26_s28 }
   0x3   :  { %p2676_p1 = scmp.lt.u32.totalorder %s2672_s9, %s2953_s3 }
   0x5   :  { %p2678_p2 = pnand %p2676_p1, %p2673_p0 }
   0x7   :  { %2681 = shalt.err (!%p2678_p2)
}
   0x8   :  { %s2682_s14 = scalar_lea.vmem %s27_s28, 16384  ;;  %p2687_p4 = scmp.lt.s32.totalorder %s27_s28, %s27_s28 }
   0x9   :  { %p2683_p3 = scmp.ne.s32.totalorder %s27_s28, %s2682_s14  ;;  %p2688_p5 = scmp.lt.s32.totalorder %s2682_s14, %s2682_s14 }
   0xb   :  { %p2689_p6 = por %p2688_p5, %p2687_p4 }
   0xd   :  { %p2690_p7 = pnand %p2689_p6, %p2683_p3 }
   0xf   :  { %2693 = shalt.err (!%p2690_p7)
}
  0x10   :  { %s2721_s15 = smov 128   ;;  %s2722_s16 = smov 8  }
  0x11   :  { %32 = dma.hbm_to_vmem [thread:$0]  %s2953_s3, 16384, %s27_s28, [#allocation3], %s2721_s15, %s2721_s15, %s2722_s16  }
  0x12   :  { %s2723_s19 = smov [#allocation4]   ;;  %s2694_s23 = scalar_lea.hbm %s2956_s6, 16384 }
  0x13   :  { %s42_s20 = sshll.u32 %s2723_s19, 4  ;;  %p2695_p8 = scmp.ne.s32.totalorder %s2956_s6, %s2694_s23  ;;  %s43_s20 = int_to_ptr.vmem [resolvable:$true] %s42_s20 }
  0x14   :  { %p2698_p9 = scmp.lt.u32.totalorder %s2694_s23, %s2956_s6 }
  0x16   :  { %p2700_p10 = pnand %p2698_p9, %p2695_p8 }
  0x18   :  { %2703 = shalt.err (!%p2700_p10)
}
  0x19   :  { %s2704_s29 = scalar_lea.vmem %s43_s20, 16384  ;;  %p2709_p12 = scmp.lt.s32.totalorder %s43_s20, %s43_s20 }
  0x1a   :  { %p2705_p11 = scmp.ne.s32.totalorder %s43_s20, %s2704_s29  ;;  %p2710_p13 = scmp.lt.s32.totalorder %s2704_s29, %s2704_s29 }
  0x1c   :  { %p2711_p0 = por %p2710_p13, %p2709_p12 }
  0x1e   :  { %p2712_p1 = pnand %p2711_p0, %p2705_p11 }
  0x20   :  { %2715 = shalt.err (!%p2712_p1)
}
  0x21   :  { %s2724_s3 = smov 512   ;;  %s2725_s28 = smov 32  }
  0x22   :  { %48 = dma.hbm_to_vmem [thread:$0]  %s2956_s6, 16384, %s43_s20, [#allocation5], %s2724_s3, %s2724_s3, %s2725_s28  }
  0x23   :  { %2716 = dma.done.wait [#allocation3], 16384  }
  0x24   :  { %2717 = vsyncadd [#allocation3], 4294950912 }
  0x25   :  { %2718 = dma.done.wait [#allocation5], 16384  }
  0x26   :  { %2719 = vsyncadd [#allocation5], 4294950912  ;;  %v2726_v0 = vmov 0   ;;  %v2454_v1 = vld [vmem:[%s2954_s4 + $0x4] ss:$8 sps:$4 sm:$0xff]  }
  0x27   :  { %332 = vmatprep.mubr.bf16.mxu0 %v2726_v0  ;;  %2453 = vset.pattern.permute.xlu0 %v2726_v0  ;;  %v2456_v2 = vld [vmem:[#allocation2 + $0x4] ss:$8 sps:$4 sm:$0xff]   ;;  %v2458_v3 = vld [vmem:[%s2954_s4] ss:$8 sps:$4 sm:$0xff]   ;;  %v2460_v5 = vld [vmem:[%s2954_s4 + $0x14] ss:$8 sps:$4 sm:$0xff]  }
  0x28   :  { %300 = vmatprep.subr.bf16.mxu0 %v2454_v1  ;;  %v2459_v4 = vld [vmem:[#allocation2] ss:$8 sps:$4 sm:$0xff]   ;;  %981 = vmatprep.subr.bf16.mxu1 %v2456_v2  ;;  %v2462_v6 = vld [vmem:[#allocation2 + $0x14] ss:$8 sps:$4 sm:$0xff]   ;;  %v2464_v7 = vld [vmem:[%s2954_s4 + $0x10] ss:$8 sps:$4 sm:$0xff]  }
  0x29   :  { %301 = vmatpush1.bf16.msra.mxu0 %v2458_v3  ;;  %982 = vmatpush1.bf16.msra.mxu1 %v2459_v4  ;;  %v2465_v8 = vld [vmem:[#allocation2 + $0x10] ss:$8 sps:$4 sm:$0xff]   ;;  %v2466_v9 = vld [vmem:[%s2954_s4 + $0x24] ss:$8 sps:$4 sm:$0xff]   ;;  %v2470_v11 = vld [vmem:[%s2954_s4 + $0x20] ss:$8 sps:$4 sm:$0xff]  }
  0x2a   :  { %302 = vmatprep.subr.bf16.mxu0 %v2460_v5  ;;  %983 = vmatprep.subr.bf16.mxu1 %v2462_v6  ;;  %v2468_v10 = vld [vmem:[#allocation2 + $0x24] ss:$8 sps:$4 sm:$0xff]   ;;  %v2471_v12 = vld [vmem:[#allocation2 + $0x20] ss:$8 sps:$4 sm:$0xff]   ;;  %v2472_v13 = vld [vmem:[%s2954_s4 + $0x34] ss:$8 sps:$4 sm:$0xff]  }
  0x2b   :  { %v2474_v14 = vld [vmem:[#allocation2 + $0x34] ss:$8 sps:$4 sm:$0xff]   ;;  %v2476_v15 = vld [vmem:[%s2954_s4 + $0x30] ss:$8 sps:$4 sm:$0xff]   ;;  %v2478_v17 = vld [vmem:[%s2954_s4 + $0x44] ss:$8 sps:$4 sm:$0xff]  }
  0x2c   :  { %v2477_v16 = vld [vmem:[#allocation2 + $0x30] ss:$8 sps:$4 sm:$0xff]   ;;  %v2480_v18 = vld [vmem:[#allocation2 + $0x44] ss:$8 sps:$4 sm:$0xff]   ;;  %v2482_v19 = vld [vmem:[%s2954_s4 + $0x40] ss:$8 sps:$4 sm:$0xff]  }
  0x2d   :  { %303 = vmatpush1.bf16.msra.mxu0 %v2464_v7  ;;  %984 = vmatpush1.bf16.msra.mxu1 %v2465_v8  ;;  %v2483_v20 = vld [vmem:[#allocation2 + $0x40] ss:$8 sps:$4 sm:$0xff]   ;;  %v2484_v21 = vld [vmem:[%s2954_s4 + $0x54] ss:$8 sps:$4 sm:$0xff]   ;;  %v2488_v23 = vld [vmem:[%s2954_s4 + $0x50] ss:$8 sps:$4 sm:$0xff]  }
  0x2e   :  { %304 = vmatprep.subr.bf16.mxu0 %v2466_v9  ;;  %985 = vmatprep.subr.bf16.mxu1 %v2468_v10  ;;  %v2486_v22 = vld [vmem:[#allocation2 + $0x54] ss:$8 sps:$4 sm:$0xff]   ;;  %v2489_v24 = vld [vmem:[#allocation2 + $0x50] ss:$8 sps:$4 sm:$0xff]   ;;  %v2490_v25 = vld [vmem:[%s2954_s4 + $0x64] ss:$8 sps:$4 sm:$0xff]  }
  0x2f   :  { %v2492_v26 = vld [vmem:[#allocation2 + $0x64] ss:$8 sps:$4 sm:$0xff]   ;;  %v2494_v27 = vld [vmem:[%s2954_s4 + $0x60] ss:$8 sps:$4 sm:$0xff]   ;;  %v2496_v29 = vld [vmem:[%s2954_s4 + $0x74] ss:$8 sps:$4 sm:$0xff]  }
  0x30   :  { %v2495_v28 = vld [vmem:[#allocation2 + $0x60] ss:$8 sps:$4 sm:$0xff]   ;;  %v2498_v30 = vld [vmem:[#allocation2 + $0x74] ss:$8 sps:$4 sm:$0xff]   ;;  %v2500_v31 = vld [vmem:[%s2954_s4 + $0x70] ss:$8 sps:$4 sm:$0xff]  }
  0x31   :  { %305 = vmatpush1.bf16.msra.mxu0 %v2470_v11  ;;  %986 = vmatpush1.bf16.msra.mxu1 %v2471_v12  ;;  %v2501_v32 = vld [vmem:[#allocation2 + $0x70] ss:$8 sps:$4 sm:$0xff]   ;;  %v202_v33 = vld [vmem:[%s2951_s1] sm:$0xff]  ;;  %v2508_v39 = vld [vmem:[#allocation2 + $0x94] ss:$8 sps:$4 sm:$0xff]  }
  0x32   :  { %306 = vmatprep.subr.bf16.mxu0 %v2472_v13  ;;  %987 = vmatprep.subr.bf16.mxu1 %v2474_v14  ;;  %v2502_v34 = vld [vmem:[#allocation2 + $0x84] ss:$8 sps:$4 sm:$0xff]   ;;  %v203_v36 = vpack.c.bf16 %v202_v33, %v202_v33  ;;  %v2504_v37 = vld [vmem:[#allocation2 + $0x100] ss:$8 sps:$4 sm:$0xff]   ;;  %v2512_v40 = vld [vmem:[#allocation2 + $0x114] ss:$8 sps:$4 sm:$0xff]  }
  0x33   :  { %v2506_v35 = vld [vmem:[#allocation2 + $0x104] ss:$8 sps:$4 sm:$0xff]   ;;  %v2507_v38 = vld [vmem:[#allocation2 + $0x80] ss:$8 sps:$4 sm:$0xff]   ;;  %v2510_v41 = vld [vmem:[#allocation2 + $0x110] ss:$8 sps:$4 sm:$0xff]  }
  0x34   :  { %v2513_v42 = vld [vmem:[#allocation2 + $0x90] ss:$8 sps:$4 sm:$0xff]   ;;  %v2514_v43 = vld [vmem:[#allocation2 + $0xa4] ss:$8 sps:$4 sm:$0xff]   ;;  %v2516_v45 = vld [vmem:[#allocation2 + $0x120] ss:$8 sps:$4 sm:$0xff]  }
  0x35   :  { %307 = vmatpush1.bf16.msra.mxu0 %v2476_v15  ;;  %988 = vmatpush1.bf16.msra.mxu1 %v2477_v16  ;;  %v2518_v44 = vld [vmem:[#allocation2 + $0x124] ss:$8 sps:$4 sm:$0xff]   ;;  %v2519_v46 = vld [vmem:[#allocation2 + $0xa0] ss:$8 sps:$4 sm:$0xff]   ;;  %v2520_v47 = vld [vmem:[#allocation2 + $0xb4] ss:$8 sps:$4 sm:$0xff]  }
  0x36   :  { %308 = vmatprep.subr.bf16.mxu0 %v2478_v17  ;;  %989 = vmatprep.subr.bf16.mxu1 %v2480_v18  ;;  %v2524_v48 = vld [vmem:[#allocation2 + $0x134] ss:$8 sps:$4 sm:$0xff]   ;;  %v2522_v49 = vld [vmem:[#allocation2 + $0x130] ss:$8 sps:$4 sm:$0xff]   ;;  %v59_v50 = vld [vmem:[%s2950_s0 + $0x8] sm:$0xff] }
  0x37   :  { %v2525_v51 = vld [vmem:[#allocation2 + $0xb0] ss:$8 sps:$4 sm:$0xff]   ;;  %v2526_v52 = vld [vmem:[#allocation2 + $0xc4] ss:$8 sps:$4 sm:$0xff]   ;;  %v67_v53 = vpack.c.bf16 %v59_v50, %v59_v50  ;;  %v2528_v55 = vld [vmem:[#allocation2 + $0x140] ss:$8 sps:$4 sm:$0xff]  }
  0x38   :  { %v2530_v54 = vld [vmem:[#allocation2 + $0x144] ss:$8 sps:$4 sm:$0xff]   ;;  %v2531_v56 = vld [vmem:[#allocation2 + $0xc0] ss:$8 sps:$4 sm:$0xff]   ;;  %v2532_v57 = vld [vmem:[#allocation2 + $0xd4] ss:$8 sps:$4 sm:$0xff]  }
  0x39   :  { %309 = vmatpush1.bf16.msra.mxu0 %v2482_v19  ;;  %990 = vmatpush1.bf16.msra.mxu1 %v2483_v20  ;;  %v2536_v58 = vld [vmem:[#allocation2 + $0x154] ss:$8 sps:$4 sm:$0xff]   ;;  %v2534_v59 = vld [vmem:[#allocation2 + $0x150] ss:$8 sps:$4 sm:$0xff]   ;;  %v2538_v61 = vld [vmem:[#allocation2 + $0xe4] ss:$8 sps:$4 sm:$0xff]  }
  0x3a   :  { %310 = vmatprep.subr.bf16.mxu0 %v2484_v21  ;;  %991 = vmatprep.subr.bf16.mxu1 %v2486_v22  ;;  %v2537_v60 = vld [vmem:[#allocation2 + $0xd0] ss:$8 sps:$4 sm:$0xff]   ;;  %v2542_v62 = vld [vmem:[#allocation2 + $0x164] ss:$8 sps:$4 sm:$0xff]   ;;  %v2540_v63 = vld [vmem:[#allocation2 + $0x160] ss:$8 sps:$4 sm:$0xff]  }
  0x3b   :  { %1013 = vmatprep.mubr.bf16.mxu1 %v67_v53  ;;  %v2543_v0 = vld [vmem:[#allocation2 + $0xe0] ss:$8 sps:$4 sm:$0xff]   ;;  %v2544_v1 = vld [vmem:[#allocation2 + $0xf4] ss:$8 sps:$4 sm:$0xff]   ;;  %v2546_v3 = vld [vmem:[#allocation2 + $0x170] ss:$8 sps:$4 sm:$0xff]  }
  0x3c   :  { %v2548_v2 = vld [vmem:[#allocation2 + $0x174] ss:$8 sps:$4 sm:$0xff]   ;;  %v2549_v4 = vld [vmem:[#allocation2 + $0xf0] ss:$8 sps:$4 sm:$0xff]   ;;  %v58_v5 = vld [vmem:[%s2950_s0] sm:$0xff] }
  0x3d   :  { %311 = vmatpush1.bf16.msra.mxu0 %v2488_v23  ;;  %992 = vmatpush1.bf16.msra.mxu1 %v2489_v24  ;;  %v2552_v6 = vld [vmem:[#allocation2 + $0x184] ss:$8 sps:$4 sm:$0xff]   ;;  %v66_v8 = vpack.c.bf16 %v58_v5, %v58_v5  ;;  %v2550_v9 = vld [vmem:[#allocation2 + $0x180] ss:$8 sps:$4 sm:$0xff]   ;;  %v2558_v11 = vld [vmem:[#allocation2 + $0x194] ss:$8 sps:$4 sm:$0xff]  }
  0x3e   :  { %312 = vmatprep.subr.bf16.mxu0 %v2490_v25  ;;  %993 = vmatprep.subr.bf16.mxu1 %v2492_v26  ;;  %v2555_v7 = vld [vmem:[#allocation2 + $0x204] ss:$8 sps:$4 sm:$0xff]   ;;  %v2553_v10 = vld [vmem:[#allocation2 + $0x200] ss:$8 sps:$4 sm:$0xff]   ;;  %v2561_v12 = vld [vmem:[#allocation2 + $0x214] ss:$8 sps:$4 sm:$0xff]  }
  0x3f   :  { %v61_v13 = vld [vmem:[%s2950_s0 + $0x18] sm:$0xff]  ;;  %v2564_v17 = vld [vmem:[#allocation2 + $0x1a4] ss:$8 sps:$4 sm:$0xff]   ;;  %v2562_v19 = vld [vmem:[#allocation2 + $0x1a0] ss:$8 sps:$4 sm:$0xff]  }
  0x40   :  { %v69_v14 = vpack.c.bf16 %v61_v13, %v61_v13  ;;  %v2556_v15 = vld [vmem:[#allocation2 + $0x190] ss:$8 sps:$4 sm:$0xff]   ;;  %v2567_v18 = vld [vmem:[#allocation2 + $0x224] ss:$8 sps:$4 sm:$0xff]   ;;  %v2565_v20 = vld [vmem:[#allocation2 + $0x220] ss:$8 sps:$4 sm:$0xff]  }
  0x41   :  { %313 = vmatpush1.bf16.msra.mxu0 %v2494_v27  ;;  %994 = vmatpush1.bf16.msra.mxu1 %v2495_v28  ;;  %v2559_v16 = vld [vmem:[#allocation2 + $0x210] ss:$8 sps:$4 sm:$0xff]   ;;  %v2570_v21 = vld [vmem:[#allocation2 + $0x1b4] ss:$8 sps:$4 sm:$0xff]   ;;  %v2576_v25 = vld [vmem:[#allocation2 + $0x1c4] ss:$8 sps:$4 sm:$0xff]  }
  0x42   :  { %314 = vmatprep.subr.bf16.mxu0 %v2496_v29  ;;  %995 = vmatprep.subr.bf16.mxu1 %v2498_v30  ;;  %v2573_v22 = vld [vmem:[#allocation2 + $0x234] ss:$8 sps:$4 sm:$0xff]   ;;  %v2568_v23 = vld [vmem:[#allocation2 + $0x1b0] ss:$8 sps:$4 sm:$0xff]   ;;  %v2579_v26 = vld [vmem:[#allocation2 + $0x244] ss:$8 sps:$4 sm:$0xff]  }
  0x43   :  { %v2571_v24 = vld [vmem:[#allocation2 + $0x230] ss:$8 sps:$4 sm:$0xff]   ;;  %v2574_v27 = vld [vmem:[#allocation2 + $0x1c0] ss:$8 sps:$4 sm:$0xff]   ;;  %v2582_v29 = vld [vmem:[#allocation2 + $0x1d4] ss:$8 sps:$4 sm:$0xff]  }
  0x44   :  { %v2577_v28 = vld [vmem:[#allocation2 + $0x240] ss:$8 sps:$4 sm:$0xff]   ;;  %v2585_v30 = vld [vmem:[#allocation2 + $0x254] ss:$8 sps:$4 sm:$0xff]   ;;  %v2588_v33 = vld [vmem:[#allocation2 + $0x1e4] ss:$8 sps:$4 sm:$0xff]  }
  0x45   :  { %315 = vmatpush1.bf16.msra.mxu0 %v2500_v31  ;;  %996 = vmatpush1.bf16.msra.mxu1 %v2501_v32  ;;  %v2580_v31 = vld [vmem:[#allocation2 + $0x1d0] ss:$8 sps:$4 sm:$0xff]   ;;  %v2609_v50 = vld [vmem:[#allocation2 + $0x314] ss:$8 sps:$4 sm:$0xff]  }
  0x46   :  { %997 = vmatprep.subr.bf16.mxu1 %v2502_v34  ;;  %1022 = vmatprep.subr.bf16.mxu0 %v2506_v35  ;;  %v2583_v32 = vld [vmem:[#allocation2 + $0x250] ss:$8 sps:$4 sm:$0xff]   ;;  %v2591_v34 = vld [vmem:[#allocation2 + $0x264] ss:$8 sps:$4 sm:$0xff]   ;;  %v2586_v35 = vld [vmem:[#allocation2 + $0x1e0] ss:$8 sps:$4 sm:$0xff]  }
  0x47   :  { %v2604_v53 = vld [vmem:[#allocation2 + $0x290] ss:$8 sps:$4 sm:$0xff]  }
  0x48   :  { %333 = vmatmul.mubr.bf16.vlgmr.msra.gmra.mrb[0].mxu0 %v203_v36  ;;  %v63_v36 = vld [vmem:[%s2950_s0 + $0x28] sm:$0xff]  ;;  %v2628_v5 = vld [vmem:[#allocation2 + $0x2d0] ss:$8 sps:$4 sm:$0xff]  }
  0x49   :  { %998 = vmatpush1.bf16.msra.mxu1 %v2507_v38  ;;  %1023 = vmatpush1.bf16.msra.mxu0 %v2504_v37  ;;  %v2589_v37 = vld [vmem:[#allocation2 + $0x260] ss:$8 sps:$4 sm:$0xff]   ;;  %v2594_v38 = vld [vmem:[#allocation2 + $0x1f4] ss:$8 sps:$4 sm:$0xff]   ;;  %v2640_v13 = vld [vmem:[#allocation2 + $0x2f0] ss:$8 sps:$4 sm:$0xff]  }
  0x4a   :  { %999 = vmatprep.subr.bf16.mxu1 %v2508_v39  ;;  %1024 = vmatprep.subr.bf16.mxu0 %v2512_v40  ;;  %v71_v39 = vpack.c.bf16 %v63_v36, %v63_v36  ;;  %v2597_v40 = vld [vmem:[#allocation2 + $0x274] ss:$8 sps:$4 sm:$0xff]   ;;  %v1167_v36 = vld [vmem:[#allocation4 + $0x20] sm:$0xff] }
  0x4b   :  { %1054 = vmatprep.mubr.bf16.mxu0 %v69_v14  ;;  %v2643_v14 = vld [vmem:[#allocation2 + $0x370] ss:$8 sps:$4 sm:$0xff]  }
  0x4d   :  { %1000 = vmatpush1.bf16.msra.mxu1 %v2513_v42  ;;  %1025 = vmatpush1.bf16.msra.mxu0 %v2510_v41  ;;  %v2592_v41 = vld [vmem:[#allocation2 + $0x1f0] ss:$8 sps:$4 sm:$0xff]  }
  0x4e   :  { %1001 = vmatprep.subr.bf16.mxu1 %v2514_v43  ;;  %1026 = vmatprep.subr.bf16.mxu0 %v2518_v44  ;;  %v2595_v42 = vld [vmem:[#allocation2 + $0x270] ss:$8 sps:$4 sm:$0xff]   ;;  %v2600_v44 = vld [vmem:[#allocation2 + $0x284] ss:$8 sps:$4 sm:$0xff]  }
  0x4f   :  { %v60_v43 = vld [vmem:[%s2950_s0 + $0x10] sm:$0xff] }
  0x51   :  { %1002 = vmatpush1.bf16.msra.mxu1 %v2519_v46  ;;  %1027 = vmatpush1.bf16.msra.mxu0 %v2516_v45  ;;  %v2603_v45 = vld [vmem:[#allocation2 + $0x304] ss:$8 sps:$4 sm:$0xff]   ;;  %v68_v46 = vpack.c.bf16 %v60_v43, %v60_v43 }
  0x52   :  { %1003 = vmatprep.subr.bf16.mxu1 %v2520_v47  ;;  %1028 = vmatprep.subr.bf16.mxu0 %v2524_v48  ;;  %v2598_v47 = vld [vmem:[#allocation2 + $0x280] ss:$8 sps:$4 sm:$0xff]  }
  0x53   :  { %v2601_v48 = vld [vmem:[#allocation2 + $0x300] ss:$8 sps:$4 sm:$0xff]  }
  0x55   :  { %1004 = vmatpush1.bf16.msra.mxu1 %v2525_v51  ;;  %1029 = vmatpush1.bf16.msra.mxu0 %v2522_v49  ;;  %v2606_v49 = vld [vmem:[#allocation2 + $0x294] ss:$8 sps:$4 sm:$0xff]  }
  0x56   :  { %1005 = vmatprep.subr.bf16.mxu1 %v2526_v52  ;;  %1030 = vmatprep.subr.bf16.mxu0 %v2530_v54  ;;  %v65_v51 = vld [vmem:[%s2950_s0 + $0x38] sm:$0xff] }
  0x57   :  { %v73_v52 = vpack.c.bf16 %v65_v51, %v65_v51  ;;  %v2607_v54 = vld [vmem:[#allocation2 + $0x310] ss:$8 sps:$4 sm:$0xff]   ;;  %v1180_v51 = vld [vmem:[#allocation4 + $0x88] sm:$0xff] }
  0x59   :  { %1006 = vmatpush1.bf16.msra.mxu1 %v2531_v56  ;;  %1031 = vmatpush1.bf16.msra.mxu0 %v2528_v55  ;;  %v2612_v55 = vld [vmem:[#allocation2 + $0x2a4] ss:$8 sps:$4 sm:$0xff]  }
  0x5a   :  { %1007 = vmatprep.subr.bf16.mxu1 %v2532_v57  ;;  %1032 = vmatprep.subr.bf16.mxu0 %v2536_v58  ;;  %v2615_v56 = vld [vmem:[#allocation2 + $0x324] ss:$8 sps:$4 sm:$0xff]   ;;  %v2610_v57 = vld [vmem:[#allocation2 + $0x2a0] ss:$8 sps:$4 sm:$0xff]  }
  0x5b   :  { %v2613_v58 = vld [vmem:[#allocation2 + $0x320] ss:$8 sps:$4 sm:$0xff]  }
  0x5d   :  { %1008 = vmatpush1.bf16.msra.mxu1 %v2537_v60  ;;  %1033 = vmatpush1.bf16.msra.mxu0 %v2534_v59  ;;  %v2618_v59 = vld [vmem:[#allocation2 + $0x2b4] ss:$8 sps:$4 sm:$0xff]  }
  0x5e   :  { %1009 = vmatprep.subr.bf16.mxu1 %v2538_v61  ;;  %1034 = vmatprep.subr.bf16.mxu0 %v2542_v62  ;;  %v2621_v60 = vld [vmem:[#allocation2 + $0x334] ss:$8 sps:$4 sm:$0xff]   ;;  %v2616_v61 = vld [vmem:[#allocation2 + $0x2b0] ss:$8 sps:$4 sm:$0xff]  }
  0x5f   :  { %v2619_v62 = vld [vmem:[#allocation2 + $0x330] ss:$8 sps:$4 sm:$0xff]  }
  0x61   :  { %1010 = vmatpush1.bf16.msra.mxu1 %v2543_v0  ;;  %1035 = vmatpush1.bf16.msra.mxu0 %v2540_v63  ;;  %v2624_v63 = vld [vmem:[#allocation2 + $0x2c4] ss:$8 sps:$4 sm:$0xff]  }
  0x62   :  { %1011 = vmatprep.subr.bf16.mxu1 %v2544_v1  ;;  %1036 = vmatprep.subr.bf16.mxu0 %v2548_v2  ;;  %v2627_v0 = vld [vmem:[#allocation2 + $0x344] ss:$8 sps:$4 sm:$0xff]   ;;  %v2622_v1 = vld [vmem:[#allocation2 + $0x2c0] ss:$8 sps:$4 sm:$0xff]  }
  0x63   :  { %v2625_v2 = vld [vmem:[#allocation2 + $0x340] ss:$8 sps:$4 sm:$0xff]  }
  0x65   :  { %1012 = vmatpush1.bf16.msra.mxu1 %v2549_v4  ;;  %1037 = vmatpush1.bf16.msra.mxu0 %v2546_v3  ;;  %v2630_v3 = vld [vmem:[#allocation2 + $0x2d4] ss:$8 sps:$4 sm:$0xff]  }
  0x66   :  { %1038 = vmatprep.subr.bf16.mxu0 %v2552_v6  ;;  %1063 = vmatprep.subr.bf16.mxu1 %v2555_v7  ;;  %v2633_v4 = vld [vmem:[#allocation2 + $0x354] ss:$8 sps:$4 sm:$0xff]   ;;  %v2631_v6 = vld [vmem:[#allocation2 + $0x350] ss:$8 sps:$4 sm:$0xff]   ;;  %v2636_v7 = vld [vmem:[#allocation2 + $0x2e4] ss:$8 sps:$4 sm:$0xff]  }
  0x68   :  { %1014 = vmatmul.mubr.bf16.vlgmr.msra.gmra.mrb[0].mxu1 %v66_v8  ;;  %v2639_v8 = vld [vmem:[#allocation2 + $0x364] ss:$8 sps:$4 sm:$0xff]  }
  0x69   :  { %1039 = vmatpush1.bf16.msra.mxu0 %v2550_v9  ;;  %1064 = vmatpush1.bf16.msra.mxu1 %v2553_v10  ;;  %v2634_v9 = vld [vmem:[#allocation2 + $0x2e0] ss:$8 sps:$4 sm:$0xff]  }
  0x6a   :  { %1040 = vmatprep.subr.bf16.mxu0 %v2558_v11  ;;  %1065 = vmatprep.subr.bf16.mxu1 %v2561_v12  ;;  %v2637_v10 = vld [vmem:[#allocation2 + $0x360] ss:$8 sps:$4 sm:$0xff]   ;;  %v2642_v11 = vld [vmem:[#allocation2 + $0x2f4] ss:$8 sps:$4 sm:$0xff]  }
  0x6b   :  { %1095 = vmatprep.mubr.bf16.mxu1 %v71_v39  ;;  %v2645_v12 = vld [vmem:[#allocation2 + $0x374] ss:$8 sps:$4 sm:$0xff]  }
  0x6d   :  { %1041 = vmatpush1.bf16.msra.mxu0 %v2556_v15  ;;  %1066 = vmatpush1.bf16.msra.mxu1 %v2559_v16  ;;  %v62_v15 = vld [vmem:[%s2950_s0 + $0x20] sm:$0xff] }
  0x6e   :  { %1042 = vmatprep.subr.bf16.mxu0 %v2564_v17  ;;  %1067 = vmatprep.subr.bf16.mxu1 %v2567_v18  ;;  %v2648_v16 = vld [vmem:[#allocation2 + $0x384] ss:$8 sps:$4 sm:$0xff]   ;;  %v70_v17 = vpack.c.bf16 %v62_v15, %v62_v15  ;;  %v2646_v18 = vld [vmem:[#allocation2 + $0x380] ss:$8 sps:$4 sm:$0xff]  }
  0x71   :  { %1043 = vmatpush1.bf16.msra.mxu0 %v2562_v19  ;;  %1068 = vmatpush1.bf16.msra.mxu1 %v2565_v20  ;;  %v2651_v19 = vld [vmem:[#allocation2 + $0x394] ss:$8 sps:$4 sm:$0xff]   ;;  %v2649_v20 = vld [vmem:[#allocation2 + $0x390] ss:$8 sps:$4 sm:$0xff]  }
  0x72   :  { %1044 = vmatprep.subr.bf16.mxu0 %v2570_v21  ;;  %1069 = vmatprep.subr.bf16.mxu1 %v2573_v22  ;;  %v2654_v21 = vld [vmem:[#allocation2 + $0x3a4] ss:$8 sps:$4 sm:$0xff]   ;;  %v2652_v22 = vld [vmem:[#allocation2 + $0x3a0] ss:$8 sps:$4 sm:$0xff]  }
  0x75   :  { %1045 = vmatpush1.bf16.msra.mxu0 %v2568_v23  ;;  %1070 = vmatpush1.bf16.msra.mxu1 %v2571_v24  ;;  %v2657_v23 = vld [vmem:[#allocation2 + $0x3b4] ss:$8 sps:$4 sm:$0xff]   ;;  %v2655_v24 = vld [vmem:[#allocation2 + $0x3b0] ss:$8 sps:$4 sm:$0xff]  }
  0x76   :  { %1046 = vmatprep.subr.bf16.mxu0 %v2576_v25  ;;  %1071 = vmatprep.subr.bf16.mxu1 %v2579_v26  ;;  %v2660_v25 = vld [vmem:[#allocation2 + $0x3c4] ss:$8 sps:$4 sm:$0xff]   ;;  %v2658_v26 = vld [vmem:[#allocation2 + $0x3c0] ss:$8 sps:$4 sm:$0xff]  }
  0x79   :  { %1047 = vmatpush1.bf16.msra.mxu0 %v2574_v27  ;;  %1072 = vmatpush1.bf16.msra.mxu1 %v2577_v28  ;;  %v2663_v27 = vld [vmem:[#allocation2 + $0x3d4] ss:$8 sps:$4 sm:$0xff]   ;;  %v2661_v28 = vld [vmem:[#allocation2 + $0x3d0] ss:$8 sps:$4 sm:$0xff]  }
  0x7a   :  { %1048 = vmatprep.subr.bf16.mxu0 %v2582_v29  ;;  %1073 = vmatprep.subr.bf16.mxu1 %v2585_v30  ;;  %v2666_v29 = vld [vmem:[#allocation2 + $0x3e4] ss:$8 sps:$4 sm:$0xff]   ;;  %v2664_v30 = vld [vmem:[#allocation2 + $0x3e0] ss:$8 sps:$4 sm:$0xff]  }
  0x7d   :  { %1049 = vmatpush1.bf16.msra.mxu0 %v2580_v31  ;;  %1074 = vmatpush1.bf16.msra.mxu1 %v2583_v32  ;;  %v2669_v31 = vld [vmem:[#allocation2 + $0x3f4] ss:$8 sps:$4 sm:$0xff]   ;;  %v2667_v32 = vld [vmem:[#allocation2 + $0x3f0] ss:$8 sps:$4 sm:$0xff]  }
  0x7e   :  { %1050 = vmatprep.subr.bf16.mxu0 %v2588_v33  ;;  %1075 = vmatprep.subr.bf16.mxu1 %v2591_v34  ;;  %v64_v33 = vld [vmem:[%s2950_s0 + $0x30] sm:$0xff] }
  0x7f   :  { %v72_v34 = vpack.c.bf16 %v64_v33, %v64_v33  ;;  %v1227_v33 = vld [vmem:[#allocation4 + $0x200] sm:$0xff] }
  0x81   :  { %1051 = vmatpush1.bf16.msra.mxu0 %v2586_v35  ;;  %1076 = vmatpush1.bf16.msra.mxu1 %v2589_v37  ;;  %v1163_v35 = vld [vmem:[#allocation4] sm:$0xff]  ;;  %v1164_v37 = vld [vmem:[#allocation4 + $0x8] sm:$0xff] }
  0x82   :  { %1052 = vmatprep.subr.bf16.mxu0 %v2594_v38  ;;  %1077 = vmatprep.subr.bf16.mxu1 %v2597_v40  ;;  %v2318_v38 = vcombine.low %v1163_v35, %v1167_v36  ;;  %v2319_v39 = vcombine.high %v1163_v35, %v1167_v36  ;;  %v1168_v40 = vld [vmem:[#allocation4 + $0x28] sm:$0xff] }
  0x83   :  { %v2320_v43 = vcombine.low %v1164_v37, %v1168_v40 }
  0x85   :  { %1053 = vmatpush1.bf16.msra.mxu0 %v2592_v41  ;;  %1078 = vmatpush1.bf16.msra.mxu1 %v2595_v42  ;;  %v1171_v41 = vld [vmem:[#allocation4 + $0x40] sm:$0xff] }
  0x86   :  { %1079 = vmatprep.subr.bf16.mxu1 %v2600_v44  ;;  %1104 = vmatprep.subr.bf16.mxu0 %v2603_v45  ;;  %v1175_v42 = vld [vmem:[#allocation4 + $0x60] sm:$0xff]  ;;  %v2321_v44 = vcombine.high %v1164_v37, %v1168_v40 }
  0x87   :  { %v2327_v45 = vcombine.high %v1171_v41, %v1175_v42 }
  0x88   :  { %1055 = vmatmul.mubr.bf16.vlgmr.msra.gmra.mrb[4].mxu0 %v68_v46  ;;  %v1172_v46 = vld [vmem:[#allocation4 + $0x48] sm:$0xff] }
  0x89   :  { %1080 = vmatpush1.bf16.msra.mxu1 %v2598_v47  ;;  %1105 = vmatpush1.bf16.msra.mxu0 %v2601_v48  ;;  %v1176_v47 = vld [vmem:[#allocation4 + $0x68] sm:$0xff]  ;;  %v1179_v48 = vld [vmem:[#allocation4 + $0x80] sm:$0xff] }
  0x8a   :  { %1081 = vmatprep.subr.bf16.mxu1 %v2606_v49  ;;  %1106 = vmatprep.subr.bf16.mxu0 %v2609_v50  ;;  %v2329_v49 = vcombine.high %v1172_v46, %v1176_v47  ;;  %v1183_v50 = vld [vmem:[#allocation4 + $0xa0] sm:$0xff] }
  0x8b   :  { %1136 = vmatprep.mubr.bf16.mxu0 %v73_v52  ;;  %v1184_v52 = vld [vmem:[#allocation4 + $0xa8] sm:$0xff] }
  0x8d   :  { %1082 = vmatpush1.bf16.msra.mxu1 %v2604_v53  ;;  %1107 = vmatpush1.bf16.msra.mxu0 %v2607_v54  ;;  %v2326_v53 = vcombine.low %v1171_v41, %v1175_v42  ;;  %v2328_v54 = vcombine.low %v1172_v46, %v1176_v47  ;;  %v1235_v41 = vld [vmem:[#allocation4 + $0x240] sm:$0xff] }
  0x8e   :  { %1083 = vmatprep.subr.bf16.mxu1 %v2612_v55  ;;  %1108 = vmatprep.subr.bf16.mxu0 %v2615_v56  ;;  %v2335_v55 = vcombine.high %v1179_v48, %v1183_v50  ;;  %v2337_v56 = vcombine.high %v1180_v51, %v1184_v52  ;;  %v1239_v42 = vld [vmem:[#allocation4 + $0x260] sm:$0xff] }
  0x8f   :  { %v2391_v47 = vcombine.high %v1235_v41, %v1239_v42 }
  0x91   :  { %1084 = vmatpush1.bf16.msra.mxu1 %v2610_v57  ;;  %1109 = vmatpush1.bf16.msra.mxu0 %v2613_v58  ;;  %v1187_v57 = vld [vmem:[#allocation4 + $0xc0] sm:$0xff] }
  0x92   :  { %1085 = vmatprep.subr.bf16.mxu1 %v2618_v59  ;;  %1110 = vmatprep.subr.bf16.mxu0 %v2621_v60  ;;  %v1191_v58 = vld [vmem:[#allocation4 + $0xe0] sm:$0xff]  ;;  %v1188_v59 = vld [vmem:[#allocation4 + $0xc8] sm:$0xff] }
  0x93   :  { %v1192_v60 = vld [vmem:[#allocation4 + $0xe8] sm:$0xff] }
  0x95   :  { %1086 = vmatpush1.bf16.msra.mxu1 %v2616_v61  ;;  %1111 = vmatpush1.bf16.msra.mxu0 %v2619_v62  ;;  %v2334_v61 = vcombine.low %v1179_v48, %v1183_v50  ;;  %v2336_v62 = vcombine.low %v1180_v51, %v1184_v52  ;;  %v1247_v50 = vld [vmem:[#allocation4 + $0x2a0] sm:$0xff]  ;;  %v1244_v51 = vld [vmem:[#allocation4 + $0x288] sm:$0xff] }
  0x96   :  { %1087 = vmatprep.subr.bf16.mxu1 %v2624_v63  ;;  %1112 = vmatprep.subr.bf16.mxu0 %v2627_v0  ;;  %v2343_v63 = vcombine.high %v1187_v57, %v1191_v58  ;;  %v2345_v0 = vcombine.high %v1188_v59, %v1192_v60  ;;  %v1248_v52 = vld [vmem:[#allocation4 + $0x2a8] sm:$0xff] }
  0x99   :  { %1088 = vmatpush1.bf16.msra.mxu1 %v2622_v1  ;;  %1113 = vmatpush1.bf16.msra.mxu0 %v2625_v2  ;;  %v1195_v1 = vld [vmem:[#allocation4 + $0x100] sm:$0xff] }
  0x9a   :  { %1089 = vmatprep.subr.bf16.mxu1 %v2630_v3  ;;  %1114 = vmatprep.subr.bf16.mxu0 %v2633_v4  ;;  %v1199_v2 = vld [vmem:[#allocation4 + $0x120] sm:$0xff]  ;;  %v1196_v3 = vld [vmem:[#allocation4 + $0x108] sm:$0xff] }
  0x9b   :  { %v1200_v4 = vld [vmem:[#allocation4 + $0x128] sm:$0xff] }
  0x9d   :  { %1090 = vmatpush1.bf16.msra.mxu1 %v2628_v5  ;;  %1115 = vmatpush1.bf16.msra.mxu0 %v2631_v6  ;;  %v2342_v5 = vcombine.low %v1187_v57, %v1191_v58  ;;  %v2344_v6 = vcombine.low %v1188_v59, %v1192_v60  ;;  %v1251_v57 = vld [vmem:[#allocation4 + $0x2c0] sm:$0xff]  ;;  %v1252_v59 = vld [vmem:[#allocation4 + $0x2c8] sm:$0xff] }
  0x9e   :  { %1091 = vmatprep.subr.bf16.mxu1 %v2636_v7  ;;  %1116 = vmatprep.subr.bf16.mxu0 %v2639_v8  ;;  %v2351_v7 = vcombine.high %v1195_v1, %v1199_v2  ;;  %v2353_v8 = vcombine.high %v1196_v3, %v1200_v4  ;;  %v1255_v58 = vld [vmem:[#allocation4 + $0x2e0] sm:$0xff]  ;;  %v1256_v60 = vld [vmem:[#allocation4 + $0x2e8] sm:$0xff] }
  0xa1   :  { %1092 = vmatpush1.bf16.msra.mxu1 %v2634_v9  ;;  %1117 = vmatpush1.bf16.msra.mxu0 %v2637_v10  ;;  %v1203_v9 = vld [vmem:[#allocation4 + $0x140] sm:$0xff] }
  0xa2   :  { %1093 = vmatprep.subr.bf16.mxu1 %v2642_v11  ;;  %1118 = vmatprep.subr.bf16.mxu0 %v2645_v12  ;;  %v1207_v10 = vld [vmem:[#allocation4 + $0x160] sm:$0xff]  ;;  %v1204_v11 = vld [vmem:[#allocation4 + $0x148] sm:$0xff] }
  0xa3   :  { %v1208_v12 = vld [vmem:[#allocation4 + $0x168] sm:$0xff]  ;;  %v2359_v15 = vcombine.high %v1203_v9, %v1207_v10 }
  0xa5   :  { %1094 = vmatpush1.bf16.msra.mxu1 %v2640_v13  ;;  %1119 = vmatpush1.bf16.msra.mxu0 %v2643_v14  ;;  %v2350_v13 = vcombine.low %v1195_v1, %v1199_v2  ;;  %v2352_v14 = vcombine.low %v1196_v3, %v1200_v4  ;;  %v1259_v1 = vld [vmem:[#allocation4 + $0x300] sm:$0xff]  ;;  %v1260_v3 = vld [vmem:[#allocation4 + $0x308] sm:$0xff] }
  0xa6   :  { %1120 = vmatprep.subr.bf16.mxu0 %v2648_v16  ;;  %1973 = vmatprep.subr.bf16.mxu1 %v2319_v39  ;;  %v2361_v16 = vcombine.high %v1204_v11, %v1208_v12  ;;  %v1232_v39 = vld [vmem:[#allocation4 + $0x228] sm:$0xff]  ;;  %v1263_v2 = vld [vmem:[#allocation4 + $0x320] sm:$0xff] }
  0xa7   :  { %v1264_v4 = vld [vmem:[#allocation4 + $0x328] sm:$0xff] }
  0xa8   :  { %1096 = vmatmul.mubr.bf16.vlgmr.msra.gmra.mrb[4].mxu1 %v70_v17  ;;  %v2358_v17 = vcombine.low %v1203_v9, %v1207_v10  ;;  %v1267_v9 = vld [vmem:[#allocation4 + $0x340] sm:$0xff] }
  0xa9   :  { %1121 = vmatpush1.bf16.msra.mxu0 %v2646_v18  ;;  %1974 = vmatpush1.bf16.msra.mxu1 %v2318_v38  ;;  %v2360_v18 = vcombine.low %v1204_v11, %v1208_v12  ;;  %v1228_v38 = vld [vmem:[#allocation4 + $0x208] sm:$0xff]  ;;  %v1271_v10 = vld [vmem:[#allocation4 + $0x360] sm:$0xff] }
  0xaa   :  { %1122 = vmatprep.subr.bf16.mxu0 %v2651_v19  ;;  %1975 = vmatprep.subr.bf16.mxu1 %v2327_v45  ;;  %v1211_v19 = vld [vmem:[#allocation4 + $0x180] sm:$0xff]  ;;  %v2385_v40 = vcombine.high %v1228_v38, %v1232_v39  ;;  %v2384_v46 = vcombine.low %v1228_v38, %v1232_v39  ;;  %v1268_v11 = vld [vmem:[#allocation4 + $0x348] sm:$0xff]  ;;  %v2871_v39 = vld [vmem:[#allocation4 + $0x10] sm:$0xff] }
  0xab   :  { %v1272_v12 = vld [vmem:[#allocation4 + $0x368] sm:$0xff] }
  0xad   :  { %1123 = vmatpush1.bf16.msra.mxu0 %v2649_v20  ;;  %1976 = vmatpush1.bf16.msra.mxu1 %v2326_v53  ;;  %v1215_v20 = vld [vmem:[#allocation4 + $0x1a0] sm:$0xff]  ;;  %v2390_v53 = vcombine.low %v1235_v41, %v1239_v42  ;;  %v2875_v41 = vld [vmem:[#allocation4 + $0x18] sm:$0xff] }
  0xae   :  { %1124 = vmatprep.subr.bf16.mxu0 %v2654_v21  ;;  %1977 = vmatprep.subr.bf16.mxu1 %v2335_v55  ;;  %v1212_v21 = vld [vmem:[#allocation4 + $0x188] sm:$0xff] }
  0xb1   :  { %1125 = vmatpush1.bf16.msra.mxu0 %v2652_v22  ;;  %1978 = vmatpush1.bf16.msra.mxu1 %v2334_v61  ;;  %v2367_v22 = vcombine.high %v1211_v19, %v1215_v20 }
  0xb2   :  { %1126 = vmatprep.subr.bf16.mxu0 %v2657_v23  ;;  %1979 = vmatprep.subr.bf16.mxu1 %v2343_v63  ;;  %v1216_v23 = vld [vmem:[#allocation4 + $0x1a8] sm:$0xff]  ;;  %v2407_v63 = vcombine.high %v1251_v57, %v1255_v58 }
  0xb5   :  { %1127 = vmatpush1.bf16.msra.mxu0 %v2655_v24  ;;  %1980 = vmatpush1.bf16.msra.mxu1 %v2342_v5  ;;  %v2366_v24 = vcombine.low %v1211_v19, %v1215_v20  ;;  %v2406_v5 = vcombine.low %v1251_v57, %v1255_v58  ;;  %v1275_v19 = vld [vmem:[#allocation4 + $0x380] sm:$0xff] }
  0xb6   :  { %1128 = vmatprep.subr.bf16.mxu0 %v2660_v25  ;;  %1981 = vmatprep.subr.bf16.mxu1 %v2351_v7  ;;  %v2368_v25 = vcombine.low %v1212_v21, %v1216_v23  ;;  %v2415_v7 = vcombine.high %v1259_v1, %v1263_v2  ;;  %v1279_v20 = vld [vmem:[#allocation4 + $0x3a0] sm:$0xff] }
  0xb9   :  { %1129 = vmatpush1.bf16.msra.mxu0 %v2658_v26  ;;  %1982 = vmatpush1.bf16.msra.mxu1 %v2350_v13  ;;  %v2369_v26 = vcombine.high %v1212_v21, %v1216_v23  ;;  %v2414_v13 = vcombine.low %v1259_v1, %v1263_v2  ;;  %v1276_v21 = vld [vmem:[#allocation4 + $0x388] sm:$0xff]  ;;  %v2431_v23 = vcombine.high %v1275_v19, %v1279_v20 }
  0xba   :  { %1130 = vmatprep.subr.bf16.mxu0 %v2663_v27  ;;  %1983 = vmatprep.subr.bf16.mxu1 %v2359_v15  ;;  %v1219_v27 = vld [vmem:[#allocation4 + $0x1c0] sm:$0xff]  ;;  %v2423_v15 = vcombine.high %v1267_v9, %v1271_v10 }
  0xbd   :  { %1131 = vmatpush1.bf16.msra.mxu0 %v2661_v28  ;;  %1984 = vmatpush1.bf16.msra.mxu1 %v2358_v17  ;;  %v1223_v28 = vld [vmem:[#allocation4 + $0x1e0] sm:$0xff]  ;;  %v2422_v17 = vcombine.low %v1267_v9, %v1271_v10 }
  0xbe   :  { %1132 = vmatprep.subr.bf16.mxu0 %v2666_v29  ;;  %1985 = vmatprep.subr.bf16.mxu1 %v2367_v22  ;;  %v1220_v29 = vld [vmem:[#allocation4 + $0x1c8] sm:$0xff] }
  0xc1   :  { %1133 = vmatpush1.bf16.msra.mxu0 %v2664_v30  ;;  %1986 = vmatpush1.bf16.msra.mxu1 %v2366_v24  ;;  %v2374_v30 = vcombine.low %v1219_v27, %v1223_v28  ;;  %v1280_v24 = vld [vmem:[#allocation4 + $0x3a8] sm:$0xff] }
  0xc2   :  { %1134 = vmatprep.subr.bf16.mxu0 %v2669_v31  ;;  %v2375_v31 = vcombine.high %v1219_v27, %v1223_v28  ;;  %v2432_v27 = vcombine.low %v1276_v21, %v1280_v24  ;;  %v2433_v28 = vcombine.high %v1276_v21, %v1280_v24 }
  0xc4   :  { %1987 = vmatprep.subr.bf16.mxu1 %v2375_v31  ;;  %v1283_v31 = vld [vmem:[#allocation4 + $0x3c0] sm:$0xff] }
  0xc5   :  { %1135 = vmatpush1.bf16.msra.mxu0 %v2667_v32  ;;  %v1224_v32 = vld [vmem:[#allocation4 + $0x1e8] sm:$0xff]  ;;  %1988 = vmatpush1.bf16.msra.mxu1 %v2374_v30 }
  0xc6   :  { %2014 = vmatprep.subr.bf16.mxu0 %v2321_v44  ;;  %v2376_v35 = vcombine.low %v1220_v29, %v1224_v32  ;;  %v2377_v36 = vcombine.high %v1220_v29, %v1224_v32  ;;  %v1240_v44 = vld [vmem:[#allocation4 + $0x268] sm:$0xff]  ;;  %v1287_v32 = vld [vmem:[#allocation4 + $0x3e0] sm:$0xff] }
  0xc8   :  { %1137 = vmatmul.mubr.bf16.vlgmr.msra.gmra.mrb[8].mxu0 %v72_v34  ;;  %v1231_v34 = vld [vmem:[#allocation4 + $0x220] sm:$0xff] }
  0xc9   :  { %2015 = vmatpush1.bf16.msra.mxu0 %v2320_v43  ;;  %v2383_v37 = vcombine.high %v1227_v33, %v1231_v34  ;;  %v1236_v43 = vld [vmem:[#allocation4 + $0x248] sm:$0xff]  ;;  %v2382_v45 = vcombine.low %v1227_v33, %v1231_v34  ;;  %v2439_v34 = vcombine.high %v1283_v31, %v1287_v32 }
  0xca   :  { %2016 = vmatprep.subr.bf16.mxu0 %v2329_v49  ;;  %v2393_v48 = vcombine.high %v1236_v43, %v1240_v44  ;;  %v1243_v49 = vld [vmem:[#allocation4 + $0x280] sm:$0xff]  ;;  %v1284_v33 = vld [vmem:[#allocation4 + $0x3c8] sm:$0xff] }
  0xcb   :  { %1989 = vmatprep.subr.bf16.mxu1 %v2383_v37  ;;  %v2399_v55 = vcombine.high %v1243_v49, %v1247_v50  ;;  %v2398_v61 = vcombine.low %v1243_v49, %v1247_v50 }
  0xcc   :  { %1990 = vmatpush1.bf16.msra.mxu1 %v2382_v45 }
  0xcd   :  { %2017 = vmatpush1.bf16.msra.mxu0 %v2328_v54  ;;  %1991 = vmatprep.subr.bf16.mxu1 %v2391_v47  ;;  %v2392_v54 = vcombine.low %v1236_v43, %v1240_v44  ;;  %v2879_v43 = vld [vmem:[#allocation4 + $0x38] sm:$0xff] }
  0xce   :  { %2018 = vmatprep.subr.bf16.mxu0 %v2337_v56  ;;  %v2401_v56 = vcombine.high %v1244_v51, %v1248_v52  ;;  %v2324_v45 = vcombine.low %v2875_v41, %v2879_v43 }
  0xd0   :  { %1992 = vmatpush1.bf16.msra.mxu1 %v2390_v53 }
  0xd1   :  { %2019 = vmatpush1.bf16.msra.mxu0 %v2336_v62  ;;  %1993 = vmatprep.subr.bf16.mxu1 %v2399_v55  ;;  %v2400_v62 = vcombine.low %v1244_v51, %v1248_v52 }
  0xd2   :  { %2020 = vmatprep.subr.bf16.mxu0 %v2345_v0  ;;  %v2409_v0 = vcombine.high %v1252_v59, %v1256_v60 }
  0xd4   :  { %1994 = vmatpush1.bf16.msra.mxu1 %v2398_v61 }
  0xd5   :  { %2021 = vmatpush1.bf16.msra.mxu0 %v2344_v6  ;;  %1995 = vmatprep.subr.bf16.mxu1 %v2407_v63  ;;  %v2408_v6 = vcombine.low %v1252_v59, %v1256_v60  ;;  %v2137_v59 = vld [vmem:[%s2952_s2] sm:$0xff] }
  0xd6   :  { %2022 = vmatprep.subr.bf16.mxu0 %v2353_v8  ;;  %v2417_v8 = vcombine.high %v1260_v3, %v1264_v4  ;;  %v2141_v60 = vsub.f32 0.0, %v2137_v59  ;;  %vm2138_vm0 = vcmp.ge.f32.partialorder %v2137_v59, 0.0  ;;  %vm2139_vm1 = vcmp.le.f32.partialorder %v2137_v59, 1.0  ;;  %v1206_v59 = vld [vmem:[#allocation4 + $0x158] sm:$0xff] }
  0xd7   :  { %vm2140_vm2 = vmand %vm2138_vm0, %vm2139_vm1 }
  0xd8   :  { %1996 = vmatpush1.bf16.msra.mxu1 %v2406_v5  ;;  %v2142_v61 = vmul.f32 8.517193, %v2141_v60  ;;  %v1210_v60 = vld [vmem:[#allocation4 + $0x178] sm:$0xff] }
  0xd9   :  { %2023 = vmatpush1.bf16.msra.mxu0 %v2352_v14  ;;  %1997 = vmatprep.subr.bf16.mxu1 %v2415_v7  ;;  %v2416_v14 = vcombine.low %v1260_v3, %v1264_v4 }
  0xda   :  { %2024 = vmatprep.subr.bf16.mxu0 %v2361_v16  ;;  %v2425_v16 = vcombine.high %v1268_v11, %v1272_v12 }
  0xdc   :  { %1998 = vmatpush1.bf16.msra.mxu1 %v2414_v13 }
  0xdd   :  { %2025 = vmatpush1.bf16.msra.mxu0 %v2360_v18  ;;  %1999 = vmatprep.subr.bf16.mxu1 %v2423_v15  ;;  %v2424_v18 = vcombine.low %v1268_v11, %v1272_v12  ;;  %v1145_v11 = vld [vmem:[%s2955_s5] sm:$0x3] }
  0xde   :  { %2026 = vmatprep.subr.bf16.mxu0 %v2369_v26  ;;  %v2430_v26 = vcombine.low %v1275_v19, %v1279_v20 }
  0xe0   :  { %2000 = vmatpush1.bf16.msra.mxu1 %v2422_v17 }
  0xe1   :  { %2027 = vmatpush1.bf16.msra.mxu0 %v2368_v25  ;;  %2001 = vmatprep.subr.bf16.mxu1 %v2431_v23 }
  0xe2   :  { %2028 = vmatprep.subr.bf16.mxu0 %v2377_v36  ;;  %v2438_v36 = vcombine.low %v1283_v31, %v1287_v32  ;;  %v1181_v31 = vld [vmem:[#allocation4 + $0x90] sm:$0xff] }
  0xe4   :  { %2002 = vmatpush1.bf16.msra.mxu1 %v2430_v26  ;;  %v1177_v26 = vld [vmem:[#allocation4 + $0x70] sm:$0xff] }
  0xe5   :  { %2029 = vmatpush1.bf16.msra.mxu0 %v2376_v35  ;;  %v1288_v35 = vld [vmem:[#allocation4 + $0x3e8] sm:$0xff]  ;;  %2003 = vmatprep.subr.bf16.mxu1 %v2439_v34  ;;  %v1185_v34 = vld [vmem:[#allocation4 + $0xb0] sm:$0xff] }
  0xe6   :  { %2030 = vmatprep.subr.bf16.mxu0 %v2385_v40  ;;  %v2440_v37 = vcombine.low %v1284_v33, %v1288_v35  ;;  %v2441_v38 = vcombine.high %v1284_v33, %v1288_v35  ;;  %v2873_v40 = vld [vmem:[#allocation4 + $0x30] sm:$0xff]  ;;  %v1182_v35 = vld [vmem:[#allocation4 + $0x98] sm:$0xff] }
  0xe7   :  { %v2323_v42 = vcombine.high %v2871_v39, %v2873_v40  ;;  %v2322_v44 = vcombine.low %v2871_v39, %v2873_v40  ;;  %v2338_v39 = vcombine.low %v1181_v31, %v1185_v34 }
  0xe8   :  { %2004 = vmatpush1.bf16.msra.mxu1 %v2438_v36  ;;  %v1186_v36 = vld [vmem:[#allocation4 + $0xb8] sm:$0xff] }
  0xe9   :  { %2031 = vmatpush1.bf16.msra.mxu0 %v2384_v46  ;;  %v2325_v46 = vcombine.high %v2875_v41, %v2879_v43  ;;  %2055 = vmatprep.subr.bf16.mxu1 %v2323_v42  ;;  %v2339_v42 = vcombine.high %v1181_v31, %v1185_v34  ;;  %v2340_v40 = vcombine.low %v1182_v35, %v1186_v36  ;;  %v1238_v31 = vld [vmem:[#allocation4 + $0x258] sm:$0xff] }
  0xea   :  { %2032 = vmatprep.subr.bf16.mxu0 %v2393_v48 }
  0xed   :  { %2033 = vmatpush1.bf16.msra.mxu0 %v2392_v54 }
  0xee   :  { %2034 = vmatprep.subr.bf16.mxu0 %v2401_v56 }
  0xf1   :  { %2035 = vmatpush1.bf16.msra.mxu0 %v2400_v62  ;;  %v2143_v62 = vmul.f32 1.442695, %v2142_v61 }
  0xf2   :  { %2036 = vmatprep.subr.bf16.mxu0 %v2409_v0 }
  0xf3   :  { %2670 = vpow2.f32 %v2143_v62 }
  0xf5   :  { %2037 = vmatpush1.bf16.msra.mxu0 %v2408_v6 }
  0xf6   :  { %2038 = vmatprep.subr.bf16.mxu0 %v2417_v8  ;;  %v1147_v8 = vlaneseq }
  0xf8   :  { %v2890_v9 = vshrl.u32 %v1147_v8, 7 }
  0xf9   :  { %2039 = vmatpush1.bf16.msra.mxu0 %v2416_v14 }
  0xfa   :  { %2040 = vmatprep.subr.bf16.mxu0 %v2425_v16  ;;  %v1149_v10 = vsub.s32 0, %v2890_v9  ;;  %v1153_v12 = vsub.s32 1, %v2890_v9 }
  0xfc   :  { %v1150_v13 = vrot.slane %v1145_v11, %v1149_v10  ;;  %v1154_v15 = vrot.slane %v1145_v11, %v1153_v12  ;;  %v1221_v11 = vld [vmem:[#allocation4 + $0x1d0] sm:$0xff] }
  0xfd   :  { %2041 = vmatpush1.bf16.msra.mxu0 %v2424_v18  ;;  %v2671_v63 = vpop.eup %2670 }
  0xfe   :  { %2042 = vmatprep.subr.bf16.mxu0 %v2433_v28  ;;  %v2145_v0 = vmul.f32 100.0, %v2671_v63  ;;  %v1178_v28 = vld [vmem:[#allocation4 + $0x78] sm:$0xff] }
 0x100   :  { %v2146_v1 = vsel %vm2140_vm2, %v2145_v0, 0.0  ;;  %v2365_v0 = vcombine.high %v1206_v59, %v1210_v60 }
 0x101   :  { %2043 = vmatpush1.bf16.msra.mxu0 %v2432_v27  ;;  %2149 = vperm.xlu0 %2453, %v2146_v1   ;;  %v1174_v27 = vld [vmem:[#allocation4 + $0x58] sm:$0xff]  ;;  %v1213_v1 = vld [vmem:[#allocation4 + $0x190] sm:$0xff] }
 0x102   :  { %2044 = vmatprep.subr.bf16.mxu0 %v2441_v38  ;;  %v2333_v33 = vcombine.high %v1174_v27, %v1178_v28  ;;  %v2332_v38 = vcombine.low %v1174_v27, %v1178_v28  ;;  %v1237_v28 = vld [vmem:[#allocation4 + $0x250] sm:$0xff] }
 0x105   :  { %2045 = vmatpush1.bf16.msra.mxu0 %v2440_v37 }
 0x106   :  { %2096 = vmatprep.subr.bf16.mxu0 %v2325_v46  ;;  %v2341_v46 = vcombine.high %v1182_v35, %v1186_v36 }
 0x11b   :  { %v334_v22 = vpop.f32.mrb[0].mxu0 }
 0x11c   :  { %v336_v25 = vpop.f32.mrb[1].mxu0 }
 0x11d   :  { %v338_v29 = vpop.f32.mrb[2].mxu0 }
 0x11e   :  { %v339_v30 = vpop.f32.mrb[3].mxu0 }
 0x13b   :  { %v1015_v47 = vpop.f32.mrb[0].mxu1 }
 0x13c   :  { %v1016_v48 = vadd.f32 %v1015_v47, %v334_v22  ;;  %v1017_v49 = vpop.f32.mrb[1].mxu1  ;;  %v1189_v47 = vld [vmem:[#allocation4 + $0xd0] sm:$0xff] }
 0x13d   :  { %v1018_v50 = vadd.f32 %v1017_v49, %v336_v25  ;;  %v1019_v51 = vpop.f32.mrb[2].mxu1  ;;  %v1173_v25 = vld [vmem:[#allocation4 + $0x50] sm:$0xff]  ;;  %v1190_v49 = vld [vmem:[#allocation4 + $0xd8] sm:$0xff] }
 0x13e   :  { %v1020_v52 = vpop.f32.mrb[3].mxu1  ;;  %v2331_v32 = vcombine.high %v1173_v25, %v1177_v26  ;;  %v2330_v37 = vcombine.low %v1173_v25, %v1177_v26  ;;  %v1198_v51 = vld [vmem:[#allocation4 + $0x118] sm:$0xff] }
 0x13f   :  { %v1202_v52 = vld [vmem:[#allocation4 + $0x138] sm:$0xff] }
 0x140   :  { %v2356_v62 = vcombine.low %v1198_v51, %v1202_v52 }
 0x15b   :  { %v1056_v53 = vpop.f32.mrb[4].mxu0 }
 0x15c   :  { %v1057_v54 = vadd.f32 %v1056_v53, %v1016_v48  ;;  %v1058_v55 = vpop.f32.mrb[5].mxu0  ;;  %v1193_v48 = vld [vmem:[#allocation4 + $0xf0] sm:$0xff] }
 0x15d   :  { %v1059_v56 = vadd.f32 %v1058_v55, %v1018_v50  ;;  %v1060_v57 = vpop.f32.mrb[6].mxu0  ;;  %v1194_v50 = vld [vmem:[#allocation4 + $0xf8] sm:$0xff]  ;;  %v2347_v41 = vcombine.high %v1189_v47, %v1193_v48  ;;  %v2346_v53 = vcombine.low %v1189_v47, %v1193_v48 }
 0x15e   :  { %v1061_v58 = vpop.f32.mrb[7].mxu0  ;;  %v2349_v43 = vcombine.high %v1190_v49, %v1194_v50  ;;  %v1205_v57 = vld [vmem:[#allocation4 + $0x150] sm:$0xff] }
 0x15f   :  { %v1209_v58 = vld [vmem:[#allocation4 + $0x170] sm:$0xff] }
 0x160   :  { %v2363_v63 = vcombine.high %v1205_v57, %v1209_v58 }
 0x17b   :  { %v1097_v2 = vpop.f32.mrb[4].mxu1 }
 0x17c   :  { %v1098_v3 = vadd.f32 %v1097_v2, %v1057_v54  ;;  %v1099_v4 = vpop.f32.mrb[5].mxu1  ;;  %v2348_v54 = vcombine.low %v1190_v49, %v1194_v50  ;;  %v1217_v2 = vld [vmem:[#allocation4 + $0x1b0] sm:$0xff] }
 0x17d   :  { %v1100_v5 = vadd.f32 %v1099_v4, %v1059_v56  ;;  %v1101_v6 = vpop.f32.mrb[6].mxu1  ;;  %v2357_v56 = vcombine.high %v1198_v51, %v1202_v52  ;;  %v1218_v4 = vld [vmem:[#allocation4 + $0x1b8] sm:$0xff] }
 0x17e   :  { %v1102_v7 = vpop.f32.mrb[7].mxu1  ;;  %v2364_v6 = vcombine.low %v1206_v59, %v1210_v60 }
 0x17f   :  { %v2371_v7 = vcombine.high %v1213_v1, %v1217_v2 }
 0x19b   :  { %v1138_v14 = vpop.f32.mrb[8].mxu0 }
 0x19c   :  { %v1139_v16 = vadd.f32 %v1138_v14, %v1098_v3  ;;  %v1140_v17 = vpop.f32.mrb[9].mxu0  ;;  %v1214_v3 = vld [vmem:[#allocation4 + $0x198] sm:$0xff] }
 0x19d   :  { %v1141_v18 = vadd.f32 %v1140_v17, %v1100_v5  ;;  %v1142_v19 = vpop.f32.mrb[10].mxu0  ;;  %v2362_v5 = vcombine.low %v1205_v57, %v1209_v58  ;;  %v2373_v8 = vcombine.high %v1214_v3, %v1218_v4  ;;  %v1222_v14 = vld [vmem:[#allocation4 + $0x1d8] sm:$0xff]  ;;  %v2372_v17 = vcombine.low %v1214_v3, %v1218_v4 }
 0x19e   :  { %v1157_v20 = vadd.f32 %v1150_v13, %v1139_v16  ;;  %v1143_v21 = vpop.f32.mrb[11].mxu0  ;;  %v1225_v13 = vld [vmem:[#allocation4 + $0x1f0] sm:$0xff]  ;;  %v2370_v16 = vcombine.low %v1213_v1, %v1217_v2 }
 0x19f   :  { %v1158_v22 = vadd.f32 %v1154_v15, %v1141_v18  ;;  %v1226_v15 = vld [vmem:[#allocation4 + $0x1f8] sm:$0xff]  ;;  %v2379_v18 = vcombine.high %v1221_v11, %v1225_v13  ;;  %v1233_v21 = vld [vmem:[#allocation4 + $0x230] sm:$0xff] }
 0x1a0   :  { %v1159_v23 = vmax.f32 %v1157_v20, 0.0  ;;  %v2381_v19 = vcombine.high %v1222_v14, %v1226_v15  ;;  %v1229_v20 = vld [vmem:[#allocation4 + $0x210] sm:$0xff]  ;;  %v2380_v25 = vcombine.low %v1222_v14, %v1226_v15 }
 0x1a1   :  { %v1160_v24 = vmax.f32 %v1158_v22, 0.0  ;;  %v1230_v22 = vld [vmem:[#allocation4 + $0x218] sm:$0xff]  ;;  %v2387_v26 = vcombine.high %v1229_v20, %v1233_v21 }
 0x1a2   :  { %v2901_v30 = vpack.c.bf16 %v1159_v23, %v1159_v23  ;;  %v1234_v23 = vld [vmem:[#allocation4 + $0x238] sm:$0xff] }
 0x1a3   :  { %v1162_v29 = vpack.c.bf16 %v1160_v24, %v1160_v24  ;;  %v2378_v24 = vcombine.low %v1221_v11, %v1225_v13  ;;  %v2389_v27 = vcombine.high %v1230_v22, %v1234_v23  ;;  %v2388_v34 = vcombine.low %v1230_v22, %v1234_v23 }
 0x1a5   :  { %2005 = vmatprep.mubr.bf16.mxu1 %v1162_v29  ;;  %2046 = vmatprep.mubr.bf16.mxu0 %v1162_v29 }
 0x1a6   :  { %2006 = vmatmul.mubr.bf16.vlgmr.msra.gmra.mrb[8].mxu1 %v2901_v30  ;;  %2047 = vmatmul.mubr.bf16.vlgmr.msra.gmra.mrb[12].mxu0 %v2901_v30 }
 0x1a7   :  { %2056 = vmatpush1.bf16.msra.mxu1 %v2322_v44  ;;  %2097 = vmatpush1.bf16.msra.mxu0 %v2324_v45  ;;  %v1197_v44 = vld [vmem:[#allocation4 + $0x110] sm:$0xff] }
 0x1a8   :  { %2087 = vmatprep.mubr.bf16.mxu1 %v1162_v29  ;;  %2128 = vmatprep.mubr.bf16.mxu0 %v1162_v29  ;;  %v1201_v45 = vld [vmem:[#allocation4 + $0x130] sm:$0xff] }
 0x1a9   :  { %2057 = vmatprep.subr.bf16.mxu1 %v2331_v32  ;;  %2098 = vmatprep.subr.bf16.mxu0 %v2333_v33  ;;  %v2355_v55 = vcombine.high %v1197_v44, %v1201_v45  ;;  %v2354_v61 = vcombine.low %v1197_v44, %v1201_v45  ;;  %v1241_v29 = vld [vmem:[#allocation4 + $0x270] sm:$0xff]  ;;  %v1242_v32 = vld [vmem:[#allocation4 + $0x278] sm:$0xff]  ;;  %v2386_v33 = vcombine.low %v1229_v20, %v1233_v21 }
 0x1aa   :  { %v2395_v35 = vcombine.high %v1237_v28, %v1241_v29  ;;  %v2397_v36 = vcombine.high %v1238_v31, %v1242_v32  ;;  %v2394_v47 = vcombine.low %v1237_v28, %v1241_v29  ;;  %v2396_v48 = vcombine.low %v1238_v31, %v1242_v32 }
 0x1ab   :  { %2058 = vmatpush1.bf16.msra.mxu1 %v2330_v37  ;;  %2099 = vmatpush1.bf16.msra.mxu0 %v2332_v38  ;;  %v1245_v37 = vld [vmem:[#allocation4 + $0x290] sm:$0xff]  ;;  %v1307_v28 = vsub.s32 3, %v2890_v9 }
 0x1ac   :  { %2059 = vmatprep.subr.bf16.mxu1 %v2339_v42  ;;  %2100 = vmatprep.subr.bf16.mxu0 %v2341_v46  ;;  %v1249_v38 = vld [vmem:[#allocation4 + $0x2b0] sm:$0xff]  ;;  %v1246_v42 = vld [vmem:[#allocation4 + $0x298] sm:$0xff] }
 0x1ad   :  { %v1250_v46 = vld [vmem:[#allocation4 + $0x2b8] sm:$0xff]  ;;  %v2403_v49 = vcombine.high %v1245_v37, %v1249_v38  ;;  %v2402_v44 = vcombine.low %v1245_v37, %v1249_v38 }
 0x1ae   :  { %v2405_v50 = vcombine.high %v1246_v42, %v1250_v46  ;;  %v2404_v45 = vcombine.low %v1246_v42, %v1250_v46 }
 0x1af   :  { %2060 = vmatpush1.bf16.msra.mxu1 %v2338_v39  ;;  %2101 = vmatpush1.bf16.msra.mxu0 %v2340_v40  ;;  %v1253_v39 = vld [vmem:[#allocation4 + $0x2d0] sm:$0xff] }
 0x1b0   :  { %2061 = vmatprep.subr.bf16.mxu1 %v2347_v41  ;;  %2102 = vmatprep.subr.bf16.mxu0 %v2349_v43  ;;  %v1257_v40 = vld [vmem:[#allocation4 + $0x2f0] sm:$0xff]  ;;  %v1254_v41 = vld [vmem:[#allocation4 + $0x2d8] sm:$0xff] }
 0x1b1   :  { %v1258_v43 = vld [vmem:[#allocation4 + $0x2f8] sm:$0xff]  ;;  %v2411_v51 = vcombine.high %v1253_v39, %v1257_v40  ;;  %v2410_v57 = vcombine.low %v1253_v39, %v1257_v40 }
 0x1b2   :  { %v2413_v52 = vcombine.high %v1254_v41, %v1258_v43  ;;  %v2412_v58 = vcombine.low %v1254_v41, %v1258_v43 }
 0x1b3   :  { %2062 = vmatpush1.bf16.msra.mxu1 %v2346_v53  ;;  %2103 = vmatpush1.bf16.msra.mxu0 %v2348_v54  ;;  %v1261_v53 = vld [vmem:[#allocation4 + $0x310] sm:$0xff] }
 0x1b4   :  { %2063 = vmatprep.subr.bf16.mxu1 %v2355_v55  ;;  %2104 = vmatprep.subr.bf16.mxu0 %v2357_v56  ;;  %v1265_v54 = vld [vmem:[#allocation4 + $0x330] sm:$0xff]  ;;  %v1262_v55 = vld [vmem:[#allocation4 + $0x318] sm:$0xff] }
 0x1b5   :  { %v1266_v56 = vld [vmem:[#allocation4 + $0x338] sm:$0xff]  ;;  %v2419_v59 = vcombine.high %v1261_v53, %v1265_v54  ;;  %v2418_v1 = vcombine.low %v1261_v53, %v1265_v54 }
 0x1b6   :  { %v2421_v60 = vcombine.high %v1262_v55, %v1266_v56  ;;  %v2420_v2 = vcombine.low %v1262_v55, %v1266_v56 }
 0x1b7   :  { %2064 = vmatpush1.bf16.msra.mxu1 %v2354_v61  ;;  %2105 = vmatpush1.bf16.msra.mxu0 %v2356_v62  ;;  %v1269_v61 = vld [vmem:[#allocation4 + $0x350] sm:$0xff] }
 0x1b8   :  { %2065 = vmatprep.subr.bf16.mxu1 %v2363_v63  ;;  %2106 = vmatprep.subr.bf16.mxu0 %v2365_v0  ;;  %v1273_v62 = vld [vmem:[#allocation4 + $0x370] sm:$0xff]  ;;  %v1270_v63 = vld [vmem:[#allocation4 + $0x358] sm:$0xff] }
 0x1b9   :  { %v1274_v0 = vld [vmem:[#allocation4 + $0x378] sm:$0xff]  ;;  %v2427_v3 = vcombine.high %v1269_v61, %v1273_v62  ;;  %v2426_v11 = vcombine.low %v1269_v61, %v1273_v62 }
 0x1ba   :  { %v2429_v4 = vcombine.high %v1270_v63, %v1274_v0  ;;  %v2428_v13 = vcombine.low %v1270_v63, %v1274_v0 }
 0x1bb   :  { %2066 = vmatpush1.bf16.msra.mxu1 %v2362_v5  ;;  %2107 = vmatpush1.bf16.msra.mxu0 %v2364_v6  ;;  %v1277_v5 = vld [vmem:[#allocation4 + $0x390] sm:$0xff] }
 0x1bc   :  { %2067 = vmatprep.subr.bf16.mxu1 %v2371_v7  ;;  %2108 = vmatprep.subr.bf16.mxu0 %v2373_v8  ;;  %v1281_v6 = vld [vmem:[#allocation4 + $0x3b0] sm:$0xff]  ;;  %v1278_v7 = vld [vmem:[#allocation4 + $0x398] sm:$0xff] }
 0x1bd   :  { %v1282_v8 = vld [vmem:[#allocation4 + $0x3b8] sm:$0xff]  ;;  %v2435_v14 = vcombine.high %v1277_v5, %v1281_v6  ;;  %v2434_v20 = vcombine.low %v1277_v5, %v1281_v6 }
 0x1be   :  { %v2437_v15 = vcombine.high %v1278_v7, %v1282_v8  ;;  %v2436_v21 = vcombine.low %v1278_v7, %v1282_v8 }
 0x1bf   :  { %2068 = vmatpush1.bf16.msra.mxu1 %v2370_v16  ;;  %2109 = vmatpush1.bf16.msra.mxu0 %v2372_v17  ;;  %v1285_v16 = vld [vmem:[#allocation4 + $0x3d0] sm:$0xff] }
 0x1c0   :  { %2069 = vmatprep.subr.bf16.mxu1 %v2379_v18  ;;  %2110 = vmatprep.subr.bf16.mxu0 %v2381_v19  ;;  %v1289_v17 = vld [vmem:[#allocation4 + $0x3f0] sm:$0xff]  ;;  %v1286_v18 = vld [vmem:[#allocation4 + $0x3d8] sm:$0xff] }
 0x1c1   :  { %v1290_v19 = vld [vmem:[#allocation4 + $0x3f8] sm:$0xff]  ;;  %v2443_v22 = vcombine.high %v1285_v16, %v1289_v17 }
 0x1c2   :  { %v2445_v23 = vcombine.high %v1286_v18, %v1290_v19 }
 0x1c3   :  { %2070 = vmatpush1.bf16.msra.mxu1 %v2378_v24  ;;  %2111 = vmatpush1.bf16.msra.mxu0 %v2380_v25  ;;  %v2442_v24 = vcombine.low %v1285_v16, %v1289_v17  ;;  %v2444_v25 = vcombine.low %v1286_v18, %v1290_v19 }
 0x1c4   :  { %2071 = vmatprep.subr.bf16.mxu1 %v2387_v26  ;;  %2112 = vmatprep.subr.bf16.mxu0 %v2389_v27  ;;  %v1303_v26 = vsub.s32 2, %v2890_v9  ;;  %v1291_v27 = vld [vmem:[%s2957_s7] sm:$0xff] }
 0x1c5   :  { %v1296_v29 = vrot.slane %v1291_v27, %v1149_v10  ;;  %v1300_v32 = vrot.slane %v1291_v27, %v1153_v12  ;;  %v1311_v12 = vsub.s32 4, %v2890_v9 }
 0x1c6   :  { %v1304_v31 = vrot.slane %v1291_v27, %v1303_v26 }
 0x1c7   :  { %2072 = vmatpush1.bf16.msra.mxu1 %v2386_v33  ;;  %2113 = vmatpush1.bf16.msra.mxu0 %v2388_v34  ;;  %v1308_v33 = vrot.slane %v1291_v27, %v1307_v28  ;;  %v2150_v34 = vpop.permute.xlu0 %2149 }
 0x1c8   :  { %2073 = vmatprep.subr.bf16.mxu1 %v2395_v35  ;;  %2114 = vmatprep.subr.bf16.mxu0 %v2397_v36 }
 0x1cb   :  { %2074 = vmatpush1.bf16.msra.mxu1 %v2394_v47  ;;  %2115 = vmatpush1.bf16.msra.mxu0 %v2396_v48 }
 0x1cc   :  { %2075 = vmatprep.subr.bf16.mxu1 %v2403_v49  ;;  %2116 = vmatprep.subr.bf16.mxu0 %v2405_v50 }
 0x1cf   :  { %2076 = vmatpush1.bf16.msra.mxu1 %v2402_v44  ;;  %2117 = vmatpush1.bf16.msra.mxu0 %v2404_v45  ;;  %v1319_v44 = vsub.s32 6, %v2890_v9  ;;  %v1315_v45 = vsub.s32 5, %v2890_v9 }
 0x1d0   :  { %2077 = vmatprep.subr.bf16.mxu1 %v2411_v51  ;;  %2118 = vmatprep.subr.bf16.mxu0 %v2413_v52  ;;  %v1323_v51 = vsub.s32 7, %v2890_v9  ;;  %v1312_v52 = vrot.slane %v1291_v27, %v1311_v12 }
 0x1d1   :  { %v1320_v53 = vrot.slane %v1291_v27, %v1319_v44  ;;  %v1316_v54 = vrot.slane %v1291_v27, %v1315_v45 }
 0x1d2   :  { %v1324_v55 = vrot.slane %v1291_v27, %v1323_v51 }
 0x1d3   :  { %2078 = vmatpush1.bf16.msra.mxu1 %v2410_v57  ;;  %2119 = vmatpush1.bf16.msra.mxu0 %v2412_v58 }
 0x1d4   :  { %2079 = vmatprep.subr.bf16.mxu1 %v2419_v59  ;;  %2120 = vmatprep.subr.bf16.mxu0 %v2421_v60 }
 0x1d7   :  { %2080 = vmatpush1.bf16.msra.mxu1 %v2418_v1  ;;  %2121 = vmatpush1.bf16.msra.mxu0 %v2420_v2 }
 0x1d8   :  { %2081 = vmatprep.subr.bf16.mxu1 %v2427_v3  ;;  %2122 = vmatprep.subr.bf16.mxu0 %v2429_v4 }
 0x1db   :  { %2082 = vmatpush1.bf16.msra.mxu1 %v2426_v11  ;;  %2123 = vmatpush1.bf16.msra.mxu0 %v2428_v13 }
 0x1dc   :  { %2083 = vmatprep.subr.bf16.mxu1 %v2435_v14  ;;  %2124 = vmatprep.subr.bf16.mxu0 %v2437_v15 }
 0x1df   :  { %2084 = vmatpush1.bf16.msra.mxu1 %v2434_v20  ;;  %2125 = vmatpush1.bf16.msra.mxu0 %v2436_v21 }
 0x1e0   :  { %2085 = vmatprep.subr.bf16.mxu1 %v2443_v22  ;;  %2126 = vmatprep.subr.bf16.mxu0 %v2445_v23 }
 0x1e3   :  { %2086 = vmatpush1.bf16.msra.mxu1 %v2442_v24  ;;  %2127 = vmatpush1.bf16.msra.mxu0 %v2444_v25 }
 0x1e6   :  { %2088 = vmatmul.mubr.bf16.vlgmr.msra.gmra.mrb[12].mxu1 %v2901_v30  ;;  %2129 = vmatmul.mubr.bf16.vlgmr.msra.gmra.mrb[16].mxu0 %v2901_v30 }
 0x279   :  { %v2007_v35 = vpop.f32.mrb[8].mxu1  ;;  %v2048_v36 = vpop.f32.mrb[12].mxu0 }
 0x27a   :  { %v2008_v30 = vadd.f32 %v2007_v35, %v1296_v29  ;;  %v2049_v37 = vadd.f32 %v2048_v36, %v1304_v31  ;;  %v2009_v38 = vpop.f32.mrb[9].mxu1  ;;  %v2050_v42 = vpop.f32.mrb[13].mxu0 }
 0x27b   :  { %v2010_v46 = vadd.f32 %v2009_v38, %v1300_v32  ;;  %v2051_v47 = vadd.f32 %v2050_v42, %v1308_v33  ;;  %v2011_v48 = vpop.f32.mrb[10].mxu1  ;;  %v2052_v49 = vpop.f32.mrb[14].mxu0 }
 0x27c   :  { %v2152_v50 = vmul.f32 %v2150_v34, %v2008_v30  ;;  %v2154_v39 = vmul.f32 %v2150_v34, %v2049_v37  ;;  %v2012_v40 = vpop.f32.mrb[11].mxu1  ;;  %v2053_v10 = vpop.f32.mrb[15].mxu0 }
 0x27d   :  { %v2153_v41 = vmul.f32 %v2150_v34, %v2010_v46  ;;  %v2155_v43 = vmul.f32 %v2150_v34, %v2051_v47 }
 0x27e   :  { %2160 = vst [vmem:[%s2958_s8] sm:$0xff] %v2152_v50  ;;  %2162 = vst [vmem:[%s2958_s8 + $0x10] sm:$0xff] %v2154_v39 }
 0x27f   :  { %2161 = vst [vmem:[%s2958_s8 + $0x8] sm:$0xff] %v2153_v41  ;;  %2163 = vst [vmem:[%s2958_s8 + $0x18] sm:$0xff] %v2155_v43 }
 0x2b9   :  { %v2089_v56 = vpop.f32.mrb[12].mxu1  ;;  %v2130_v57 = vpop.f32.mrb[16].mxu0 }
 0x2ba   :  { %v2090_v58 = vadd.f32 %v2089_v56, %v1312_v52  ;;  %v2131_v59 = vadd.f32 %v2130_v57, %v1320_v53  ;;  %v2091_v60 = vpop.f32.mrb[13].mxu1  ;;  %v2132_v61 = vpop.f32.mrb[17].mxu0 }
 0x2bb   :  { %v2092_v62 = vadd.f32 %v2091_v60, %v1316_v54  ;;  %v2133_v63 = vadd.f32 %v2132_v61, %v1324_v55  ;;  %v2093_v0 = vpop.f32.mrb[14].mxu1  ;;  %v2134_v1 = vpop.f32.mrb[18].mxu0 }
 0x2bc   :  { %v2156_v2 = vmul.f32 %v2150_v34, %v2090_v58  ;;  %v2158_v3 = vmul.f32 %v2150_v34, %v2131_v59  ;;  %v2094_v4 = vpop.f32.mrb[15].mxu1  ;;  %v2135_v5 = vpop.f32.mrb[19].mxu0 }
 0x2bd   :  { %v2157_v6 = vmul.f32 %v2150_v34, %v2092_v62  ;;  %v2159_v9 = vmul.f32 %v2150_v34, %v2133_v63 }
 0x2be   :  { %2164 = vst [vmem:[%s2958_s8 + $0x20] sm:$0xff] %v2156_v2  ;;  %2166 = vst [vmem:[%s2958_s8 + $0x30] sm:$0xff] %v2158_v3 }
 0x2bf   :  { %2165 = vst [vmem:[%s2958_s8 + $0x28] sm:$0xff] %v2157_v6  ;;  %2167 = vst [vmem:[%s2958_s8 + $0x38] sm:$0xff] %v2159_v9 }
 0x2c0   :  { %2172 = vsyncpa [#allocation3], 1 }
 0x2c1   :  { %2173 = vsyncpa [#allocation5], 1 }

</bundles_post_ra>
